<compile_context>
chip_gen: v7x
topology: tpu7x:2x2x1
jax: 0.10.0
libtpu: 0.0.40
codegen_flags: <defaults>
</compile_context>

<pallas_src>
import functools

import jax
import jax.numpy as jnp
from jax import lax
from jax.experimental import pallas as pl
from jax.experimental.pallas import tpu as pltpu


# ---------------------------------------------------------------------------
# Fused encoder + concat + autoregressive decoder kernel.
# Grid = (num_row_tiles,) marked "parallel"; all time steps unrolled in-kernel.
# ---------------------------------------------------------------------------
def _fused_seq2seq_kernel(x_ref, mend_ref,
                          e_wih_ref, e_whh_ref, e_bih_ref, e_bhh_ref,
                          d_wih_ref, d_whh_ref, d_bih_ref, d_bhh_ref,
                          wfbo_ref, bfbo_ref, wout_ref, bout_ref,
                          out_ref, *, t_in, t_out):
    rows = mend_ref.shape[0]
    H = mend_ref.shape[1]
    H2 = 2 * H
    G = 3 * H              # encoder fused-gate width
    G2 = 3 * H2            # decoder fused-gate width
    F = x_ref.shape[-1]

    # Weights arrive pre-cast to bf16 from the host; biases stay f32.
    e_wih = e_wih_ref[...]
    e_whh = e_whh_ref[...]
    e_bih = e_bih_ref[...]
    e_bhh = e_bhh_ref[...]
    d_wih = d_wih_ref[...]
    d_whh = d_whh_ref[...]
    d_bih = d_bih_ref[...]
    d_bhh = d_bhh_ref[...]
    w_fbo = wfbo_ref[...]
    b_fbo = bfbo_ref[...]
    w_out = wout_ref[...]
    b_out = bout_ref[...]

    def blend(gi, gh, h, hid):
        # PyTorch nn.GRU gate order along columns: [r | z | n]
        r = jax.nn.sigmoid(gi[:, :hid] + gh[:, :hid])
        z = jax.nn.sigmoid(gi[:, hid:2 * hid] + gh[:, hid:2 * hid])
        n = jnp.tanh(gi[:, 2 * hid:3 * hid] + r * gh[:, 2 * hid:3 * hid])
        return (1.0 - z) * n + z * h

    # ---- encoder: hoist ALL input-to-hidden projections out of the recurrence ----
    x_all = x_ref[...].astype(jnp.bfloat16).reshape(t_in * rows, F)
    gi_all = (jnp.dot(x_all, e_wih, preferred_element_type=jnp.float32) + e_bih
              ).reshape(t_in, rows, G)
    h = jnp.zeros((rows, H), jnp.float32)
    for t in range(t_in):
        gh = jnp.dot(h.astype(jnp.bfloat16), e_whh,
                     preferred_element_type=jnp.float32) + e_bhh
        h = blend(gi_all[t], gh, h, H)

    # ---- decoder initial hidden: cat([h_encode, mendGcn_encoding], -1) ----
    h_dec = jnp.concatenate([h, mend_ref[...]], axis=-1)              # (rows, 2H)

    # step 0: input projection comes from the last encoder input frame
    x_last = x_ref[t_in - 1].astype(jnp.bfloat16)
    gi = jnp.dot(x_last, d_wih, preferred_element_type=jnp.float32) + d_bih
    gh = jnp.dot(h_dec.astype(jnp.bfloat16), d_whh,
                 preferred_element_type=jnp.float32) + d_bhh
    h_dec = blend(gi, gh, h_dec, H2)

    # steps 1..t_out-1: output Linear folded into the feedback projection.
    # Each step: one matmul against [W_fb | W_out] (gives i-gates AND o_{t-1})
    # plus one matmul against W_hh.
    outs = []
    for _ in range(1, t_out):
        hb = h_dec.astype(jnp.bfloat16)
        zcat = jnp.dot(hb, w_fbo, preferred_element_type=jnp.float32) + b_fbo
        outs.append(zcat[:, G2:])                                     # o_{t-1}
        gh = jnp.dot(hb, d_whh, preferred_element_type=jnp.float32) + d_bhh
        h_dec = blend(zcat[:, :G2], gh, h_dec, H2)

    # last step's output
    outs.append(jnp.dot(h_dec.astype(jnp.bfloat16), w_out,
                        preferred_element_type=jnp.float32) + b_out)

    # lane-dense single store: (rows, t_out * O)
    out_ref[...] = jnp.concatenate(outs, axis=-1).astype(out_ref.dtype)


# ---------------------------------------------------------------------------
# Host-side parameter prep: transpose to (in, 3H)/(H, 3H), fold the output
# Linear into the decoder feedback, cast weight matrices to bf16 (biases f32).
# ---------------------------------------------------------------------------
def _prep_params(params):
    bf16, f32 = jnp.bfloat16, jnp.float32
    e_wih = params["enc_wih"].T                        # (F, 3H)
    e_whh = params["enc_whh"].T                        # (H, 3H)
    e_bih = params["enc_bih"][None, :]                 # (1, 3H)
    e_bhh = params["enc_bhh"][None, :]
    d_wih = params["dec_wih"].T                        # (F, 6H)
    d_whh = params["dec_whh"].T                        # (2H, 6H)
    d_bih = params["dec_bih"][None, :]                 # (1, 6H)
    d_bhh = params["dec_bhh"][None, :]
    w_out = params["out_w"].T                          # (2H, O)
    b_out = params["out_b"][None, :]                   # (1, O)
    # Fold output Linear into decoder feedback (f32 pre-multiplication):
    #   gi_t = o_{t-1} @ W_ih + b_ih = h_{t-1} @ (W_out @ W_ih) + (b_out @ W_ih + b_ih)
    w_fb = w_out @ d_wih                               # (2H, 6H)
    b_fb = b_out @ d_wih + d_bih                       # (1, 6H)
    w_fbo = jnp.concatenate([w_fb, w_out], axis=1)     # (2H, 6H + O)
    b_fbo = jnp.concatenate([b_fb, b_out], axis=1)     # (1, 6H + O)
    return dict(
        e_wih=e_wih.astype(bf16), e_whh=e_whh.astype(bf16),
        e_bih=e_bih.astype(f32), e_bhh=e_bhh.astype(f32),
        d_wih=d_wih.astype(bf16), d_whh=d_whh.astype(bf16),
        d_bih=d_bih.astype(f32), d_bhh=d_bhh.astype(f32),
        w_fbo=w_fbo.astype(bf16), b_fbo=b_fbo.astype(f32),
        w_out=w_out.astype(bf16), b_out=b_out.astype(f32),
    )


def run_seq2seq(x_seq, mend, w, t_out, block_rows=None):
    t_in, M, F = x_seq.shape
    H = mend.shape[1]
    O = w["w_out"].shape[1]
    assert F == O, "autoregressive feedback requires input_size == output_size"
    if block_rows is None:
        # Only split rows across tiles when per-tile work is throughput-bound;
        # also caps live recurrent state so the unrolled recurrence doesn't spill.
        block_rows = 128 if (M >= 256 and M % 128 == 0) else M
    assert M % block_rows == 0 and (block_rows % 8 == 0 or block_rows == M)
    grid = (M // block_rows,)

    def const(arr):
        shape = arr.shape
        return pl.BlockSpec(shape, lambda i: (0,) * len(shape))

    weight_args = [w["e_wih"], w["e_whh"], w["e_bih"], w["e_bhh"],
                   w["d_wih"], w["d_whh"], w["d_bih"], w["d_bhh"],
                   w["w_fbo"], w["b_fbo"], w["w_out"], w["b_out"]]

    # NOTE: constant-index weight blocks are tiny here (tens of KiB); if H scales,
    # single-buffer them (pipeline_mode=pl.Buffered(1)) / raise vmem_limit_bytes.
    return pl.pallas_call(
        functools.partial(_fused_seq2seq_kernel, t_in=t_in, t_out=t_out),
        out_shape=jax.ShapeDtypeStruct((M, t_out * O), jnp.float32),
        grid_spec=pltpu.PrefetchScalarGridSpec(
            num_scalar_prefetch=0,
            grid=grid,
            in_specs=[
                pl.BlockSpec((t_in, block_rows, F), lambda i: (0, i, 0)),   # x_seq
                pl.BlockSpec((block_rows, H), lambda i: (i, 0)),            # mend
            ] + [const(a) for a in weight_args],
            out_specs=pl.BlockSpec((block_rows, t_out * O), lambda i: (i, 0)),
        ),
        compiler_params=pltpu.CompilerParams(dimension_semantics=("parallel",)),
    )(x_seq, mend, *weight_args)


# ---------------------------------------------------------------------------
# Full forward (the FedNodePredictorClient.forward hot path)
# ---------------------------------------------------------------------------
def fed_node_predictor_forward(x, mend_encoding, params, t_out):
    """x: (B, T_in, N, F)  mend_encoding: (1, B*N, H)  ->  (B, T_out, N, O)"""
    B, T_in, N, F = x.shape
    M = B * N
    O = params["out_w"].shape[0]
    # x.permute(1, 0, 2, 3).flatten(1, 2)
    x_input = jnp.transpose(x, (1, 0, 2, 3)).reshape(T_in, M, F)
    w = _prep_params(params)
    out = run_seq2seq(x_input, mend_encoding[0], w, t_out)      # (M, T_out*O)
    # (M, T_out*O) -> (B, N, T_out, O) -> (B, T_out, N, O)
    return jnp.transpose(out.reshape(B, N, t_out, O), (0, 2, 1, 3))


# ---------------------------------------------------------------------------
# Pure-JAX f32 reference (PyTorch semantics) for sanity checking
# ---------------------------------------------------------------------------
def _gru_cell_ref(x, h, wih, whh, bih, bhh, hidden):
    hp = lax.Precision.HIGHEST
    gi = jnp.dot(x, wih.T, precision=hp) + bih
    gh = jnp.dot(h, whh.T, precision=hp) + bhh
    i_r, i_z, i_n = gi[:, :hidden], gi[:, hidden:2 * hidden], gi[:, 2 * hidden:]
    h_r, h_z, h_n = gh[:, :hidden], gh[:, hidden:2 * hidden], gh[:, 2 * hidden:]
    r = jax.nn.sigmoid(i_r + h_r)
    z = jax.nn.sigmoid(i_z + h_z)
    n = jnp.tanh(i_n + r * h_n)
    return (1.0 - z) * n + z * h


def reference_forward(x, mend_encoding, p, t_out):
    B, T_in, N, F = x.shape
    M = B * N
    H = p["enc_whh"].shape[1]
    x_input = jnp.transpose(x, (1, 0, 2, 3)).reshape(T_in, M, F)
    h = jnp.zeros((M, H), jnp.float32)
    for t in range(T_in):
        h = _gru_cell_ref(x_input[t], h, p["enc_wih"], p["enc_whh"],
                          p["enc_bih"], p["enc_bhh"], H)
    hd = jnp.concatenate([h, mend_encoding[0]], axis=-1)
    xin = x_input[-1]
    outs = []
    hp = lax.Precision.HIGHEST
    for _ in range(t_out):
        hd = _gru_cell_ref(xin, hd, p["dec_wih"], p["dec_whh"],
                           p["dec_bih"], p["dec_bhh"], 2 * H)
        o = jnp.dot(hd, p["out_w"].T, precision=hp) + p["out_b"]
        outs.append(o)
        xin = o
    out = jnp.stack(outs, axis=0)
    O = p["out_w"].shape[0]
    return jnp.transpose(out.reshape(t_out, B, N, O), (1, 0, 2, 3))


# ---------------------------------------------------------------------------
if __name__ == "__main__":
    # small shapes consistent with the module's forward
    B, T_in, T_out, N = 2, 8, 8, 4          # batch, in-seq, out-seq, nodes per client
    F = O = 2                               # input_size == output_size (autoreg. feedback)
    H = 32                                  # args.hidden_size
    M = B * N

    key = jax.random.PRNGKey(0)
    ks = jax.random.split(key, 12)

    def unif(k, shape, scale):
        return jax.random.uniform(k, shape, jnp.float32, -scale, scale)

    s_enc = 1.0 / jnp.sqrt(H)
    s_dec = 1.0 / jnp.sqrt(2 * H)
    params = {
        # encoder GRU (input F, hidden H): PyTorch nn.GRU parameter shapes
        "enc_wih": unif(ks[0], (3 * H, F), s_enc),
        "enc_whh": unif(ks[1], (3 * H, H), s_enc),
        "enc_bih": unif(ks[2], (3 * H,), s_enc),
        "enc_bhh": unif(ks[3], (3 * H,), s_enc),
        # decoder GRU (input F, hidden 2H)
        "dec_wih": unif(ks[4], (6 * H, F), s_dec),
        "dec_whh": unif(ks[5], (6 * H, 2 * H), s_dec),
        "dec_bih": unif(ks[6], (6 * H,), s_dec),
        "dec_bhh": unif(ks[7], (6 * H,), s_dec),
        # out_net: Linear(2H -> O)
        "out_w": unif(ks[8], (O, 2 * H), s_dec),
        "out_b": unif(ks[9], (O,), s_dec),
    }

    x = jax.random.normal(ks[10], (B, T_in, N, F), jnp.float32)
    # mendGcn_encoding as passed to base_model: (gru_num_layers, B*N, hidden_size)
    mend_encoding = jax.random.normal(ks[11], (1, M, H), jnp.float32)

    fwd = jax.jit(fed_node_predictor_forward, static_argnums=(3,))
    y_pred = jax.block_until_ready(fwd(x, mend_encoding, params, T_out))

    y_ref = reference_forward(x, mend_encoding, params, T_out)
    assert y_pred.shape == (B, T_out, N, O)
    # bf16 matmul operands (f32 accumulation) + folded feedback Linear in the kernel
    # vs f32 reference: observed drift is O(1e-2); 5e-2 tolerance absorbs it.
    assert jnp.max(jnp.abs(y_pred - y_ref)) < 5e-2, "mismatch vs reference"

    print("KERNEL_OK")
</pallas_src>

<mosaic_0001>
module attributes {stable_mosaic.version = 11 : i64} {
  func.func @_fused_seq2seq_kernel(%arg0: i32, %arg1: memref<8x8x2xf32, #tpu.memory_space<vmem>>, %arg2: memref<8x32xf32, #tpu.memory_space<vmem>>, %arg3: memref<2x96xbf16, #tpu.memory_space<vmem>>, %arg4: memref<32x96xbf16, #tpu.memory_space<vmem>>, %arg5: memref<1x96xf32, #tpu.memory_space<vmem>>, %arg6: memref<1x96xf32, #tpu.memory_space<vmem>>, %arg7: memref<2x192xbf16, #tpu.memory_space<vmem>>, %arg8: memref<64x192xbf16, #tpu.memory_space<vmem>>, %arg9: memref<1x192xf32, #tpu.memory_space<vmem>>, %arg10: memref<1x192xf32, #tpu.memory_space<vmem>>, %arg11: memref<64x194xbf16, #tpu.memory_space<vmem>>, %arg12: memref<1x194xf32, #tpu.memory_space<vmem>>, %arg13: memref<64x2xbf16, #tpu.memory_space<vmem>>, %arg14: memref<1x2xf32, #tpu.memory_space<vmem>>, %arg15: memref<8x16xf32, #tpu.memory_space<vmem>>) attributes {dimension_semantics = [#tpu.dimension_semantics<parallel>], iteration_bounds = array<i64: 1>, scalar_prefetch = 0 : i64, scratch_operands = 0 : i64, tpu.core_type = #tpu.core_type<tc>, window_params = [{transform_indices = @transform_0, window_bounds = array<i64: 8, 8, 2>}, {transform_indices = @transform_1, window_bounds = array<i64: 8, 32>}, {pipeline_mode = #tpu.pipeline_mode<synchronous>, transform_indices = @transform_2, window_bounds = array<i64: 2, 96>}, {pipeline_mode = #tpu.pipeline_mode<synchronous>, transform_indices = @transform_3, window_bounds = array<i64: 32, 96>}, {pipeline_mode = #tpu.pipeline_mode<synchronous>, transform_indices = @transform_4, window_bounds = array<i64: 1, 96>}, {pipeline_mode = #tpu.pipeline_mode<synchronous>, transform_indices = @transform_5, window_bounds = array<i64: 1, 96>}, {pipeline_mode = #tpu.pipeline_mode<synchronous>, transform_indices = @transform_6, window_bounds = array<i64: 2, 192>}, {pipeline_mode = #tpu.pipeline_mode<synchronous>, transform_indices = @transform_7, window_bounds = array<i64: 64, 192>}, {pipeline_mode = #tpu.pipeline_mode<synchronous>, transform_indices = @transform_8, window_bounds = array<i64: 1, 192>}, {pipeline_mode = #tpu.pipeline_mode<synchronous>, transform_indices = @transform_9, window_bounds = array<i64: 1, 192>}, {pipeline_mode = #tpu.pipeline_mode<synchronous>, transform_indices = @transform_10, window_bounds = array<i64: 64, 194>}, {pipeline_mode = #tpu.pipeline_mode<synchronous>, transform_indices = @transform_11, window_bounds = array<i64: 1, 194>}, {pipeline_mode = #tpu.pipeline_mode<synchronous>, transform_indices = @transform_12, window_bounds = array<i64: 64, 2>}, {pipeline_mode = #tpu.pipeline_mode<synchronous>, transform_indices = @transform_13, window_bounds = array<i64: 1, 2>}, {transform_indices = @transform_14, window_bounds = array<i64: 8, 16>}]} {
    %c0 = arith.constant 0 : index
    %c0_0 = arith.constant 0 : index
    %0 = vector.load %arg3[%c0, %c0_0] : memref<2x96xbf16, #tpu.memory_space<vmem>>, vector<2x96xbf16>
    %c0_1 = arith.constant 0 : index
    %c0_2 = arith.constant 0 : index
    %1 = vector.load %arg4[%c0_1, %c0_2] : memref<32x96xbf16, #tpu.memory_space<vmem>>, vector<32x96xbf16>
    %c0_3 = arith.constant 0 : index
    %c0_4 = arith.constant 0 : index
    %2 = vector.load %arg5[%c0_3, %c0_4] : memref<1x96xf32, #tpu.memory_space<vmem>>, vector<1x96xf32>
    %c0_5 = arith.constant 0 : index
    %c0_6 = arith.constant 0 : index
    %3 = vector.load %arg6[%c0_5, %c0_6] : memref<1x96xf32, #tpu.memory_space<vmem>>, vector<1x96xf32>
    %c0_7 = arith.constant 0 : index
    %c0_8 = arith.constant 0 : index
    %4 = vector.load %arg7[%c0_7, %c0_8] : memref<2x192xbf16, #tpu.memory_space<vmem>>, vector<2x192xbf16>
    %c0_9 = arith.constant 0 : index
    %c0_10 = arith.constant 0 : index
    %5 = vector.load %arg8[%c0_9, %c0_10] : memref<64x192xbf16, #tpu.memory_space<vmem>>, vector<64x192xbf16>
    %c0_11 = arith.constant 0 : index
    %c0_12 = arith.constant 0 : index
    %6 = vector.load %arg9[%c0_11, %c0_12] : memref<1x192xf32, #tpu.memory_space<vmem>>, vector<1x192xf32>
    %c0_13 = arith.constant 0 : index
    %c0_14 = arith.constant 0 : index
    %7 = vector.load %arg10[%c0_13, %c0_14] : memref<1x192xf32, #tpu.memory_space<vmem>>, vector<1x192xf32>
    %c0_15 = arith.constant 0 : index
    %c0_16 = arith.constant 0 : index
    %8 = vector.load %arg11[%c0_15, %c0_16] : memref<64x194xbf16, #tpu.memory_space<vmem>>, vector<64x194xbf16>
    %c0_17 = arith.constant 0 : index
    %c0_18 = arith.constant 0 : index
    %9 = vector.load %arg12[%c0_17, %c0_18] : memref<1x194xf32, #tpu.memory_space<vmem>>, vector<1x194xf32>
    %c0_19 = arith.constant 0 : index
    %c0_20 = arith.constant 0 : index
    %10 = vector.load %arg13[%c0_19, %c0_20] : memref<64x2xbf16, #tpu.memory_space<vmem>>, vector<64x2xbf16>
    %c0_21 = arith.constant 0 : index
    %c0_22 = arith.constant 0 : index
    %11 = vector.load %arg14[%c0_21, %c0_22] : memref<1x2xf32, #tpu.memory_space<vmem>>, vector<1x2xf32>
    %c0_23 = arith.constant 0 : index
    %c0_24 = arith.constant 0 : index
    %c0_25 = arith.constant 0 : index
    %12 = vector.load %arg1[%c0_23, %c0_24, %c0_25] : memref<8x8x2xf32, #tpu.memory_space<vmem>>, vector<8x8x2xf32>
    %13 = arith.truncf %12 : vector<8x8x2xf32> to vector<8x8x2xbf16>
    %14 = vector.shape_cast %13 : vector<8x8x2xbf16> to vector<64x2xbf16>
    %cst = arith.constant dense<0.000000e+00> : vector<64x96xf32>
    %15 = tpu.matmul %14, %0, %cst {dimension_numbers = #tpu.dot_dimension_numbers<[1], [0], [0], [1], [0, 0, 1, 1], [], []>} : vector<64x2xbf16>, vector<2x96xbf16>, vector<64x96xf32> -> vector<64x96xf32>
    %16 = vector.broadcast %2 : vector<1x96xf32> to vector<64x96xf32>
    %17 = arith.addf %15, %16 : vector<64x96xf32>
    %18 = vector.shape_cast %17 : vector<64x96xf32> to vector<8x8x96xf32>
    %cst_26 = arith.constant 0.000000e+00 : f32
    %19 = vector.broadcast %cst_26 : f32 to vector<8x32xf32>
    %20 = arith.truncf %19 : vector<8x32xf32> to vector<8x32xbf16>
    %cst_27 = arith.constant dense<0.000000e+00> : vector<8x96xf32>
    %21 = tpu.matmul %20, %1, %cst_27 {dimension_numbers = #tpu.dot_dimension_numbers<[1], [0], [0], [1], [0, 0, 1, 1], [], []>} : vector<8x32xbf16>, vector<32x96xbf16>, vector<8x96xf32> -> vector<8x96xf32>
    %22 = vector.broadcast %3 : vector<1x96xf32> to vector<8x96xf32>
    %23 = arith.addf %21, %22 : vector<8x96xf32>
    %24 = vector.extract_strided_slice %18 {offsets = [0, 0, 0], sizes = [1, 8, 96], strides = [1, 1, 1]} : vector<8x8x96xf32> to vector<1x8x96xf32>
    %25 = vector.shape_cast %24 : vector<1x8x96xf32> to vector<8x96xf32>
    %26 = vector.extract_strided_slice %25 {offsets = [0, 0], sizes = [8, 32], strides = [1, 1]} : vector<8x96xf32> to vector<8x32xf32>
    %27 = vector.extract_strided_slice %23 {offsets = [0, 0], sizes = [8, 32], strides = [1, 1]} : vector<8x96xf32> to vector<8x32xf32>
    %28 = arith.addf %26, %27 : vector<8x32xf32>
    %29 = arith.negf %28 : vector<8x32xf32>
    %30 = math.exp %29 : vector<8x32xf32>
    %cst_28 = arith.constant 1.000000e+00 : f32
    %31 = vector.broadcast %cst_28 : f32 to vector<8x32xf32>
    %32 = arith.addf %31, %30 : vector<8x32xf32>
    %33 = arith.divf %31, %32 : vector<8x32xf32>
    %34 = vector.extract_strided_slice %25 {offsets = [0, 32], sizes = [8, 32], strides = [1, 1]} : vector<8x96xf32> to vector<8x32xf32>
    %35 = vector.extract_strided_slice %23 {offsets = [0, 32], sizes = [8, 32], strides = [1, 1]} : vector<8x96xf32> to vector<8x32xf32>
    %36 = arith.addf %34, %35 : vector<8x32xf32>
    %37 = arith.negf %36 : vector<8x32xf32>
    %38 = math.exp %37 : vector<8x32xf32>
    %cst_29 = arith.constant 1.000000e+00 : f32
    %39 = vector.broadcast %cst_29 : f32 to vector<8x32xf32>
    %40 = arith.addf %39, %38 : vector<8x32xf32>
    %41 = arith.divf %39, %40 : vector<8x32xf32>
    %42 = vector.extract_strided_slice %25 {offsets = [0, 64], sizes = [8, 32], strides = [1, 1]} : vector<8x96xf32> to vector<8x32xf32>
    %43 = vector.extract_strided_slice %23 {offsets = [0, 64], sizes = [8, 32], strides = [1, 1]} : vector<8x96xf32> to vector<8x32xf32>
    %44 = arith.mulf %33, %43 : vector<8x32xf32>
    %45 = arith.addf %42, %44 : vector<8x32xf32>
    %46 = math.tanh %45 : vector<8x32xf32>
    %cst_30 = arith.constant 1.000000e+00 : f32
    %47 = vector.broadcast %cst_30 : f32 to vector<8x32xf32>
    %48 = arith.subf %47, %41 : vector<8x32xf32>
    %49 = arith.mulf %48, %46 : vector<8x32xf32>
    %50 = arith.mulf %41, %19 : vector<8x32xf32>
    %51 = arith.addf %49, %50 : vector<8x32xf32>
    %52 = arith.truncf %51 : vector<8x32xf32> to vector<8x32xbf16>
    %cst_31 = arith.constant dense<0.000000e+00> : vector<8x96xf32>
    %53 = tpu.matmul %52, %1, %cst_31 {dimension_numbers = #tpu.dot_dimension_numbers<[1], [0], [0], [1], [0, 0, 1, 1], [], []>} : vector<8x32xbf16>, vector<32x96xbf16>, vector<8x96xf32> -> vector<8x96xf32>
    %54 = vector.broadcast %3 : vector<1x96xf32> to vector<8x96xf32>
    %55 = arith.addf %53, %54 : vector<8x96xf32>
    %56 = vector.extract_strided_slice %18 {offsets = [1, 0, 0], sizes = [1, 8, 96], strides = [1, 1, 1]} : vector<8x8x96xf32> to vector<1x8x96xf32>
    %57 = vector.shape_cast %56 : vector<1x8x96xf32> to vector<8x96xf32>
    %58 = vector.extract_strided_slice %57 {offsets = [0, 0], sizes = [8, 32], strides = [1, 1]} : vector<8x96xf32> to vector<8x32xf32>
    %59 = vector.extract_strided_slice %55 {offsets = [0, 0], sizes = [8, 32], strides = [1, 1]} : vector<8x96xf32> to vector<8x32xf32>
    %60 = arith.addf %58, %59 : vector<8x32xf32>
    %61 = arith.negf %60 : vector<8x32xf32>
    %62 = math.exp %61 : vector<8x32xf32>
    %cst_32 = arith.constant 1.000000e+00 : f32
    %63 = vector.broadcast %cst_32 : f32 to vector<8x32xf32>
    %64 = arith.addf %63, %62 : vector<8x32xf32>
    %65 = arith.divf %63, %64 : vector<8x32xf32>
    %66 = vector.extract_strided_slice %57 {offsets = [0, 32], sizes = [8, 32], strides = [1, 1]} : vector<8x96xf32> to vector<8x32xf32>
    %67 = vector.extract_strided_slice %55 {offsets = [0, 32], sizes = [8, 32], strides = [1, 1]} : vector<8x96xf32> to vector<8x32xf32>
    %68 = arith.addf %66, %67 : vector<8x32xf32>
    %69 = arith.negf %68 : vector<8x32xf32>
    %70 = math.exp %69 : vector<8x32xf32>
    %cst_33 = arith.constant 1.000000e+00 : f32
    %71 = vector.broadcast %cst_33 : f32 to vector<8x32xf32>
    %72 = arith.addf %71, %70 : vector<8x32xf32>
    %73 = arith.divf %71, %72 : vector<8x32xf32>
    %74 = vector.extract_strided_slice %57 {offsets = [0, 64], sizes = [8, 32], strides = [1, 1]} : vector<8x96xf32> to vector<8x32xf32>
    %75 = vector.extract_strided_slice %55 {offsets = [0, 64], sizes = [8, 32], strides = [1, 1]} : vector<8x96xf32> to vector<8x32xf32>
    %76 = arith.mulf %65, %75 : vector<8x32xf32>
    %77 = arith.addf %74, %76 : vector<8x32xf32>
    %78 = math.tanh %77 : vector<8x32xf32>
    %cst_34 = arith.constant 1.000000e+00 : f32
    %79 = vector.broadcast %cst_34 : f32 to vector<8x32xf32>
    %80 = arith.subf %79, %73 : vector<8x32xf32>
    %81 = arith.mulf %80, %78 : vector<8x32xf32>
    %82 = arith.mulf %73, %51 : vector<8x32xf32>
    %83 = arith.addf %81, %82 : vector<8x32xf32>
    %84 = arith.truncf %83 : vector<8x32xf32> to vector<8x32xbf16>
    %cst_35 = arith.constant dense<0.000000e+00> : vector<8x96xf32>
    %85 = tpu.matmul %84, %1, %cst_35 {dimension_numbers = #tpu.dot_dimension_numbers<[1], [0], [0], [1], [0, 0, 1, 1], [], []>} : vector<8x32xbf16>, vector<32x96xbf16>, vector<8x96xf32> -> vector<8x96xf32>
    %86 = vector.broadcast %3 : vector<1x96xf32> to vector<8x96xf32>
    %87 = arith.addf %85, %86 : vector<8x96xf32>
    %88 = vector.extract_strided_slice %18 {offsets = [2, 0, 0], sizes = [1, 8, 96], strides = [1, 1, 1]} : vector<8x8x96xf32> to vector<1x8x96xf32>
    %89 = vector.shape_cast %88 : vector<1x8x96xf32> to vector<8x96xf32>
    %90 = vector.extract_strided_slice %89 {offsets = [0, 0], sizes = [8, 32], strides = [1, 1]} : vector<8x96xf32> to vector<8x32xf32>
    %91 = vector.extract_strided_slice %87 {offsets = [0, 0], sizes = [8, 32], strides = [1, 1]} : vector<8x96xf32> to vector<8x32xf32>
    %92 = arith.addf %90, %91 : vector<8x32xf32>
    %93 = arith.negf %92 : vector<8x32xf32>
    %94 = math.exp %93 : vector<8x32xf32>
    %cst_36 = arith.constant 1.000000e+00 : f32
    %95 = vector.broadcast %cst_36 : f32 to vector<8x32xf32>
    %96 = arith.addf %95, %94 : vector<8x32xf32>
    %97 = arith.divf %95, %96 : vector<8x32xf32>
    %98 = vector.extract_strided_slice %89 {offsets = [0, 32], sizes = [8, 32], strides = [1, 1]} : vector<8x96xf32> to vector<8x32xf32>
    %99 = vector.extract_strided_slice %87 {offsets = [0, 32], sizes = [8, 32], strides = [1, 1]} : vector<8x96xf32> to vector<8x32xf32>
    %100 = arith.addf %98, %99 : vector<8x32xf32>
    %101 = arith.negf %100 : vector<8x32xf32>
    %102 = math.exp %101 : vector<8x32xf32>
    %cst_37 = arith.constant 1.000000e+00 : f32
    %103 = vector.broadcast %cst_37 : f32 to vector<8x32xf32>
    %104 = arith.addf %103, %102 : vector<8x32xf32>
    %105 = arith.divf %103, %104 : vector<8x32xf32>
    %106 = vector.extract_strided_slice %89 {offsets = [0, 64], sizes = [8, 32], strides = [1, 1]} : vector<8x96xf32> to vector<8x32xf32>
    %107 = vector.extract_strided_slice %87 {offsets = [0, 64], sizes = [8, 32], strides = [1, 1]} : vector<8x96xf32> to vector<8x32xf32>
    %108 = arith.mulf %97, %107 : vector<8x32xf32>
    %109 = arith.addf %106, %108 : vector<8x32xf32>
    %110 = math.tanh %109 : vector<8x32xf32>
    %cst_38 = arith.constant 1.000000e+00 : f32
    %111 = vector.broadcast %cst_38 : f32 to vector<8x32xf32>
    %112 = arith.subf %111, %105 : vector<8x32xf32>
    %113 = arith.mulf %112, %110 : vector<8x32xf32>
    %114 = arith.mulf %105, %83 : vector<8x32xf32>
    %115 = arith.addf %113, %114 : vector<8x32xf32>
    %116 = arith.truncf %115 : vector<8x32xf32> to vector<8x32xbf16>
    %cst_39 = arith.constant dense<0.000000e+00> : vector<8x96xf32>
    %117 = tpu.matmul %116, %1, %cst_39 {dimension_numbers = #tpu.dot_dimension_numbers<[1], [0], [0], [1], [0, 0, 1, 1], [], []>} : vector<8x32xbf16>, vector<32x96xbf16>, vector<8x96xf32> -> vector<8x96xf32>
    %118 = vector.broadcast %3 : vector<1x96xf32> to vector<8x96xf32>
    %119 = arith.addf %117, %118 : vector<8x96xf32>
    %120 = vector.extract_strided_slice %18 {offsets = [3, 0, 0], sizes = [1, 8, 96], strides = [1, 1, 1]} : vector<8x8x96xf32> to vector<1x8x96xf32>
    %121 = vector.shape_cast %120 : vector<1x8x96xf32> to vector<8x96xf32>
    %122 = vector.extract_strided_slice %121 {offsets = [0, 0], sizes = [8, 32], strides = [1, 1]} : vector<8x96xf32> to vector<8x32xf32>
    %123 = vector.extract_strided_slice %119 {offsets = [0, 0], sizes = [8, 32], strides = [1, 1]} : vector<8x96xf32> to vector<8x32xf32>
    %124 = arith.addf %122, %123 : vector<8x32xf32>
    %125 = arith.negf %124 : vector<8x32xf32>
    %126 = math.exp %125 : vector<8x32xf32>
    %cst_40 = arith.constant 1.000000e+00 : f32
    %127 = vector.broadcast %cst_40 : f32 to vector<8x32xf32>
    %128 = arith.addf %127, %126 : vector<8x32xf32>
    %129 = arith.divf %127, %128 : vector<8x32xf32>
    %130 = vector.extract_strided_slice %121 {offsets = [0, 32], sizes = [8, 32], strides = [1, 1]} : vector<8x96xf32> to vector<8x32xf32>
    %131 = vector.extract_strided_slice %119 {offsets = [0, 32], sizes = [8, 32], strides = [1, 1]} : vector<8x96xf32> to vector<8x32xf32>
    %132 = arith.addf %130, %131 : vector<8x32xf32>
    %133 = arith.negf %132 : vector<8x32xf32>
    %134 = math.exp %133 : vector<8x32xf32>
    %cst_41 = arith.constant 1.000000e+00 : f32
    %135 = vector.broadcast %cst_41 : f32 to vector<8x32xf32>
    %136 = arith.addf %135, %134 : vector<8x32xf32>
    %137 = arith.divf %135, %136 : vector<8x32xf32>
    %138 = vector.extract_strided_slice %121 {offsets = [0, 64], sizes = [8, 32], strides = [1, 1]} : vector<8x96xf32> to vector<8x32xf32>
    %139 = vector.extract_strided_slice %119 {offsets = [0, 64], sizes = [8, 32], strides = [1, 1]} : vector<8x96xf32> to vector<8x32xf32>
    %140 = arith.mulf %129, %139 : vector<8x32xf32>
    %141 = arith.addf %138, %140 : vector<8x32xf32>
    %142 = math.tanh %141 : vector<8x32xf32>
    %cst_42 = arith.constant 1.000000e+00 : f32
    %143 = vector.broadcast %cst_42 : f32 to vector<8x32xf32>
    %144 = arith.subf %143, %137 : vector<8x32xf32>
    %145 = arith.mulf %144, %142 : vector<8x32xf32>
    %146 = arith.mulf %137, %115 : vector<8x32xf32>
    %147 = arith.addf %145, %146 : vector<8x32xf32>
    %148 = arith.truncf %147 : vector<8x32xf32> to vector<8x32xbf16>
    %cst_43 = arith.constant dense<0.000000e+00> : vector<8x96xf32>
    %149 = tpu.matmul %148, %1, %cst_43 {dimension_numbers = #tpu.dot_dimension_numbers<[1], [0], [0], [1], [0, 0, 1, 1], [], []>} : vector<8x32xbf16>, vector<32x96xbf16>, vector<8x96xf32> -> vector<8x96xf32>
    %150 = vector.broadcast %3 : vector<1x96xf32> to vector<8x96xf32>
    %151 = arith.addf %149, %150 : vector<8x96xf32>
    %152 = vector.extract_strided_slice %18 {offsets = [4, 0, 0], sizes = [1, 8, 96], strides = [1, 1, 1]} : vector<8x8x96xf32> to vector<1x8x96xf32>
    %153 = vector.shape_cast %152 : vector<1x8x96xf32> to vector<8x96xf32>
    %154 = vector.extract_strided_slice %153 {offsets = [0, 0], sizes = [8, 32], strides = [1, 1]} : vector<8x96xf32> to vector<8x32xf32>
    %155 = vector.extract_strided_slice %151 {offsets = [0, 0], sizes = [8, 32], strides = [1, 1]} : vector<8x96xf32> to vector<8x32xf32>
    %156 = arith.addf %154, %155 : vector<8x32xf32>
    %157 = arith.negf %156 : vector<8x32xf32>
    %158 = math.exp %157 : vector<8x32xf32>
    %cst_44 = arith.constant 1.000000e+00 : f32
    %159 = vector.broadcast %cst_44 : f32 to vector<8x32xf32>
    %160 = arith.addf %159, %158 : vector<8x32xf32>
    %161 = arith.divf %159, %160 : vector<8x32xf32>
    %162 = vector.extract_strided_slice %153 {offsets = [0, 32], sizes = [8, 32], strides = [1, 1]} : vector<8x96xf32> to vector<8x32xf32>
    %163 = vector.extract_strided_slice %151 {offsets = [0, 32], sizes = [8, 32], strides = [1, 1]} : vector<8x96xf32> to vector<8x32xf32>
    %164 = arith.addf %162, %163 : vector<8x32xf32>
    %165 = arith.negf %164 : vector<8x32xf32>
    %166 = math.exp %165 : vector<8x32xf32>
    %cst_45 = arith.constant 1.000000e+00 : f32
    %167 = vector.broadcast %cst_45 : f32 to vector<8x32xf32>
    %168 = arith.addf %167, %166 : vector<8x32xf32>
    %169 = arith.divf %167, %168 : vector<8x32xf32>
    %170 = vector.extract_strided_slice %153 {offsets = [0, 64], sizes = [8, 32], strides = [1, 1]} : vector<8x96xf32> to vector<8x32xf32>
    %171 = vector.extract_strided_slice %151 {offsets = [0, 64], sizes = [8, 32], strides = [1, 1]} : vector<8x96xf32> to vector<8x32xf32>
    %172 = arith.mulf %161, %171 : vector<8x32xf32>
    %173 = arith.addf %170, %172 : vector<8x32xf32>
    %174 = math.tanh %173 : vector<8x32xf32>
    %cst_46 = arith.constant 1.000000e+00 : f32
    %175 = vector.broadcast %cst_46 : f32 to vector<8x32xf32>
    %176 = arith.subf %175, %169 : vector<8x32xf32>
    %177 = arith.mulf %176, %174 : vector<8x32xf32>
    %178 = arith.mulf %169, %147 : vector<8x32xf32>
    %179 = arith.addf %177, %178 : vector<8x32xf32>
    %180 = arith.truncf %179 : vector<8x32xf32> to vector<8x32xbf16>
    %cst_47 = arith.constant dense<0.000000e+00> : vector<8x96xf32>
    %181 = tpu.matmul %180, %1, %cst_47 {dimension_numbers = #tpu.dot_dimension_numbers<[1], [0], [0], [1], [0, 0, 1, 1], [], []>} : vector<8x32xbf16>, vector<32x96xbf16>, vector<8x96xf32> -> vector<8x96xf32>
    %182 = vector.broadcast %3 : vector<1x96xf32> to vector<8x96xf32>
    %183 = arith.addf %181, %182 : vector<8x96xf32>
    %184 = vector.extract_strided_slice %18 {offsets = [5, 0, 0], sizes = [1, 8, 96], strides = [1, 1, 1]} : vector<8x8x96xf32> to vector<1x8x96xf32>
    %185 = vector.shape_cast %184 : vector<1x8x96xf32> to vector<8x96xf32>
    %186 = vector.extract_strided_slice %185 {offsets = [0, 0], sizes = [8, 32], strides = [1, 1]} : vector<8x96xf32> to vector<8x32xf32>
    %187 = vector.extract_strided_slice %183 {offsets = [0, 0], sizes = [8, 32], strides = [1, 1]} : vector<8x96xf32> to vector<8x32xf32>
    %188 = arith.addf %186, %187 : vector<8x32xf32>
    %189 = arith.negf %188 : vector<8x32xf32>
    %190 = math.exp %189 : vector<8x32xf32>
    %cst_48 = arith.constant 1.000000e+00 : f32
    %191 = vector.broadcast %cst_48 : f32 to vector<8x32xf32>
    %192 = arith.addf %191, %190 : vector<8x32xf32>
    %193 = arith.divf %191, %192 : vector<8x32xf32>
    %194 = vector.extract_strided_slice %185 {offsets = [0, 32], sizes = [8, 32], strides = [1, 1]} : vector<8x96xf32> to vector<8x32xf32>
    %195 = vector.extract_strided_slice %183 {offsets = [0, 32], sizes = [8, 32], strides = [1, 1]} : vector<8x96xf32> to vector<8x32xf32>
    %196 = arith.addf %194, %195 : vector<8x32xf32>
    %197 = arith.negf %196 : vector<8x32xf32>
    %198 = math.exp %197 : vector<8x32xf32>
    %cst_49 = arith.constant 1.000000e+00 : f32
    %199 = vector.broadcast %cst_49 : f32 to vector<8x32xf32>
    %200 = arith.addf %199, %198 : vector<8x32xf32>
    %201 = arith.divf %199, %200 : vector<8x32xf32>
    %202 = vector.extract_strided_slice %185 {offsets = [0, 64], sizes = [8, 32], strides = [1, 1]} : vector<8x96xf32> to vector<8x32xf32>
    %203 = vector.extract_strided_slice %183 {offsets = [0, 64], sizes = [8, 32], strides = [1, 1]} : vector<8x96xf32> to vector<8x32xf32>
    %204 = arith.mulf %193, %203 : vector<8x32xf32>
    %205 = arith.addf %202, %204 : vector<8x32xf32>
    %206 = math.tanh %205 : vector<8x32xf32>
    %cst_50 = arith.constant 1.000000e+00 : f32
    %207 = vector.broadcast %cst_50 : f32 to vector<8x32xf32>
    %208 = arith.subf %207, %201 : vector<8x32xf32>
    %209 = arith.mulf %208, %206 : vector<8x32xf32>
    %210 = arith.mulf %201, %179 : vector<8x32xf32>
    %211 = arith.addf %209, %210 : vector<8x32xf32>
    %212 = arith.truncf %211 : vector<8x32xf32> to vector<8x32xbf16>
    %cst_51 = arith.constant dense<0.000000e+00> : vector<8x96xf32>
    %213 = tpu.matmul %212, %1, %cst_51 {dimension_numbers = #tpu.dot_dimension_numbers<[1], [0], [0], [1], [0, 0, 1, 1], [], []>} : vector<8x32xbf16>, vector<32x96xbf16>, vector<8x96xf32> -> vector<8x96xf32>
    %214 = vector.broadcast %3 : vector<1x96xf32> to vector<8x96xf32>
    %215 = arith.addf %213, %214 : vector<8x96xf32>
    %216 = vector.extract_strided_slice %18 {offsets = [6, 0, 0], sizes = [1, 8, 96], strides = [1, 1, 1]} : vector<8x8x96xf32> to vector<1x8x96xf32>
    %217 = vector.shape_cast %216 : vector<1x8x96xf32> to vector<8x96xf32>
    %218 = vector.extract_strided_slice %217 {offsets = [0, 0], sizes = [8, 32], strides = [1, 1]} : vector<8x96xf32> to vector<8x32xf32>
    %219 = vector.extract_strided_slice %215 {offsets = [0, 0], sizes = [8, 32], strides = [1, 1]} : vector<8x96xf32> to vector<8x32xf32>
    %220 = arith.addf %218, %219 : vector<8x32xf32>
    %221 = arith.negf %220 : vector<8x32xf32>
    %222 = math.exp %221 : vector<8x32xf32>
    %cst_52 = arith.constant 1.000000e+00 : f32
    %223 = vector.broadcast %cst_52 : f32 to vector<8x32xf32>
    %224 = arith.addf %223, %222 : vector<8x32xf32>
    %225 = arith.divf %223, %224 : vector<8x32xf32>
    %226 = vector.extract_strided_slice %217 {offsets = [0, 32], sizes = [8, 32], strides = [1, 1]} : vector<8x96xf32> to vector<8x32xf32>
    %227 = vector.extract_strided_slice %215 {offsets = [0, 32], sizes = [8, 32], strides = [1, 1]} : vector<8x96xf32> to vector<8x32xf32>
    %228 = arith.addf %226, %227 : vector<8x32xf32>
    %229 = arith.negf %228 : vector<8x32xf32>
    %230 = math.exp %229 : vector<8x32xf32>
    %cst_53 = arith.constant 1.000000e+00 : f32
    %231 = vector.broadcast %cst_53 : f32 to vector<8x32xf32>
    %232 = arith.addf %231, %230 : vector<8x32xf32>
    %233 = arith.divf %231, %232 : vector<8x32xf32>
    %234 = vector.extract_strided_slice %217 {offsets = [0, 64], sizes = [8, 32], strides = [1, 1]} : vector<8x96xf32> to vector<8x32xf32>
    %235 = vector.extract_strided_slice %215 {offsets = [0, 64], sizes = [8, 32], strides = [1, 1]} : vector<8x96xf32> to vector<8x32xf32>
    %236 = arith.mulf %225, %235 : vector<8x32xf32>
    %237 = arith.addf %234, %236 : vector<8x32xf32>
    %238 = math.tanh %237 : vector<8x32xf32>
    %cst_54 = arith.constant 1.000000e+00 : f32
    %239 = vector.broadcast %cst_54 : f32 to vector<8x32xf32>
    %240 = arith.subf %239, %233 : vector<8x32xf32>
    %241 = arith.mulf %240, %238 : vector<8x32xf32>
    %242 = arith.mulf %233, %211 : vector<8x32xf32>
    %243 = arith.addf %241, %242 : vector<8x32xf32>
    %244 = arith.truncf %243 : vector<8x32xf32> to vector<8x32xbf16>
    %cst_55 = arith.constant dense<0.000000e+00> : vector<8x96xf32>
    %245 = tpu.matmul %244, %1, %cst_55 {dimension_numbers = #tpu.dot_dimension_numbers<[1], [0], [0], [1], [0, 0, 1, 1], [], []>} : vector<8x32xbf16>, vector<32x96xbf16>, vector<8x96xf32> -> vector<8x96xf32>
    %246 = vector.broadcast %3 : vector<1x96xf32> to vector<8x96xf32>
    %247 = arith.addf %245, %246 : vector<8x96xf32>
    %248 = vector.extract_strided_slice %18 {offsets = [7, 0, 0], sizes = [1, 8, 96], strides = [1, 1, 1]} : vector<8x8x96xf32> to vector<1x8x96xf32>
    %249 = vector.shape_cast %248 : vector<1x8x96xf32> to vector<8x96xf32>
    %250 = vector.extract_strided_slice %249 {offsets = [0, 0], sizes = [8, 32], strides = [1, 1]} : vector<8x96xf32> to vector<8x32xf32>
    %251 = vector.extract_strided_slice %247 {offsets = [0, 0], sizes = [8, 32], strides = [1, 1]} : vector<8x96xf32> to vector<8x32xf32>
    %252 = arith.addf %250, %251 : vector<8x32xf32>
    %253 = arith.negf %252 : vector<8x32xf32>
    %254 = math.exp %253 : vector<8x32xf32>
    %cst_56 = arith.constant 1.000000e+00 : f32
    %255 = vector.broadcast %cst_56 : f32 to vector<8x32xf32>
    %256 = arith.addf %255, %254 : vector<8x32xf32>
    %257 = arith.divf %255, %256 : vector<8x32xf32>
    %258 = vector.extract_strided_slice %249 {offsets = [0, 32], sizes = [8, 32], strides = [1, 1]} : vector<8x96xf32> to vector<8x32xf32>
    %259 = vector.extract_strided_slice %247 {offsets = [0, 32], sizes = [8, 32], strides = [1, 1]} : vector<8x96xf32> to vector<8x32xf32>
    %260 = arith.addf %258, %259 : vector<8x32xf32>
    %261 = arith.negf %260 : vector<8x32xf32>
    %262 = math.exp %261 : vector<8x32xf32>
    %cst_57 = arith.constant 1.000000e+00 : f32
    %263 = vector.broadcast %cst_57 : f32 to vector<8x32xf32>
    %264 = arith.addf %263, %262 : vector<8x32xf32>
    %265 = arith.divf %263, %264 : vector<8x32xf32>
    %266 = vector.extract_strided_slice %249 {offsets = [0, 64], sizes = [8, 32], strides = [1, 1]} : vector<8x96xf32> to vector<8x32xf32>
    %267 = vector.extract_strided_slice %247 {offsets = [0, 64], sizes = [8, 32], strides = [1, 1]} : vector<8x96xf32> to vector<8x32xf32>
    %268 = arith.mulf %257, %267 : vector<8x32xf32>
    %269 = arith.addf %266, %268 : vector<8x32xf32>
    %270 = math.tanh %269 : vector<8x32xf32>
    %cst_58 = arith.constant 1.000000e+00 : f32
    %271 = vector.broadcast %cst_58 : f32 to vector<8x32xf32>
    %272 = arith.subf %271, %265 : vector<8x32xf32>
    %273 = arith.mulf %272, %270 : vector<8x32xf32>
    %274 = arith.mulf %265, %243 : vector<8x32xf32>
    %275 = arith.addf %273, %274 : vector<8x32xf32>
    %c0_59 = arith.constant 0 : index
    %c0_60 = arith.constant 0 : index
    %276 = vector.load %arg2[%c0_59, %c0_60] : memref<8x32xf32, #tpu.memory_space<vmem>>, vector<8x32xf32>
    %277 = tpu.concatenate %275, %276 in 1 : vector<8x32xf32>, vector<8x32xf32> -> vector<8x64xf32>
    %c7 = arith.constant 7 : index
    %c0_61 = arith.constant 0 : index
    %c0_62 = arith.constant 0 : index
    %278 = vector.load %arg1[%c7, %c0_61, %c0_62] : memref<8x8x2xf32, #tpu.memory_space<vmem>>, vector<1x8x2xf32>
    %279 = vector.shape_cast %278 : vector<1x8x2xf32> to vector<8x2xf32>
    %280 = arith.truncf %279 : vector<8x2xf32> to vector<8x2xbf16>
    %cst_63 = arith.constant dense<0.000000e+00> : vector<8x192xf32>
    %281 = tpu.matmul %280, %4, %cst_63 {dimension_numbers = #tpu.dot_dimension_numbers<[1], [0], [0], [1], [0, 0, 1, 1], [], []>} : vector<8x2xbf16>, vector<2x192xbf16>, vector<8x192xf32> -> vector<8x192xf32>
    %282 = vector.broadcast %6 : vector<1x192xf32> to vector<8x192xf32>
    %283 = arith.addf %281, %282 : vector<8x192xf32>
    %284 = arith.truncf %277 : vector<8x64xf32> to vector<8x64xbf16>
    %cst_64 = arith.constant dense<0.000000e+00> : vector<8x192xf32>
    %285 = tpu.matmul %284, %5, %cst_64 {dimension_numbers = #tpu.dot_dimension_numbers<[1], [0], [0], [1], [0, 0, 1, 1], [], []>} : vector<8x64xbf16>, vector<64x192xbf16>, vector<8x192xf32> -> vector<8x192xf32>
    %286 = vector.broadcast %7 : vector<1x192xf32> to vector<8x192xf32>
    %287 = arith.addf %285, %286 : vector<8x192xf32>
    %288 = vector.extract_strided_slice %283 {offsets = [0, 0], sizes = [8, 64], strides = [1, 1]} : vector<8x192xf32> to vector<8x64xf32>
    %289 = vector.extract_strided_slice %287 {offsets = [0, 0], sizes = [8, 64], strides = [1, 1]} : vector<8x192xf32> to vector<8x64xf32>
    %290 = arith.addf %288, %289 : vector<8x64xf32>
    %291 = arith.negf %290 : vector<8x64xf32>
    %292 = math.exp %291 : vector<8x64xf32>
    %cst_65 = arith.constant 1.000000e+00 : f32
    %293 = vector.broadcast %cst_65 : f32 to vector<8x64xf32>
    %294 = arith.addf %293, %292 : vector<8x64xf32>
    %295 = arith.divf %293, %294 : vector<8x64xf32>
    %296 = vector.extract_strided_slice %283 {offsets = [0, 64], sizes = [8, 64], strides = [1, 1]} : vector<8x192xf32> to vector<8x64xf32>
    %297 = vector.extract_strided_slice %287 {offsets = [0, 64], sizes = [8, 64], strides = [1, 1]} : vector<8x192xf32> to vector<8x64xf32>
    %298 = arith.addf %296, %297 : vector<8x64xf32>
    %299 = arith.negf %298 : vector<8x64xf32>
    %300 = math.exp %299 : vector<8x64xf32>
    %cst_66 = arith.constant 1.000000e+00 : f32
    %301 = vector.broadcast %cst_66 : f32 to vector<8x64xf32>
    %302 = arith.addf %301, %300 : vector<8x64xf32>
    %303 = arith.divf %301, %302 : vector<8x64xf32>
    %304 = vector.extract_strided_slice %283 {offsets = [0, 128], sizes = [8, 64], strides = [1, 1]} : vector<8x192xf32> to vector<8x64xf32>
    %305 = vector.extract_strided_slice %287 {offsets = [0, 128], sizes = [8, 64], strides = [1, 1]} : vector<8x192xf32> to vector<8x64xf32>
    %306 = arith.mulf %295, %305 : vector<8x64xf32>
    %307 = arith.addf %304, %306 : vector<8x64xf32>
    %308 = math.tanh %307 : vector<8x64xf32>
    %cst_67 = arith.constant 1.000000e+00 : f32
    %309 = vector.broadcast %cst_67 : f32 to vector<8x64xf32>
    %310 = arith.subf %309, %303 : vector<8x64xf32>
    %311 = arith.mulf %310, %308 : vector<8x64xf32>
    %312 = arith.mulf %303, %277 : vector<8x64xf32>
    %313 = arith.addf %311, %312 : vector<8x64xf32>
    %314 = arith.truncf %313 : vector<8x64xf32> to vector<8x64xbf16>
    %cst_68 = arith.constant dense<0.000000e+00> : vector<8x194xf32>
    %315 = tpu.matmul %314, %8, %cst_68 {dimension_numbers = #tpu.dot_dimension_numbers<[1], [0], [0], [1], [0, 0, 1, 1], [], []>} : vector<8x64xbf16>, vector<64x194xbf16>, vector<8x194xf32> -> vector<8x194xf32>
    %316 = vector.broadcast %9 : vector<1x194xf32> to vector<8x194xf32>
    %317 = arith.addf %315, %316 : vector<8x194xf32>
    %318 = vector.extract_strided_slice %317 {offsets = [0, 192], sizes = [8, 2], strides = [1, 1]} : vector<8x194xf32> to vector<8x2xf32>
    %cst_69 = arith.constant dense<0.000000e+00> : vector<8x192xf32>
    %319 = tpu.matmul %314, %5, %cst_69 {dimension_numbers = #tpu.dot_dimension_numbers<[1], [0], [0], [1], [0, 0, 1, 1], [], []>} : vector<8x64xbf16>, vector<64x192xbf16>, vector<8x192xf32> -> vector<8x192xf32>
    %320 = vector.broadcast %7 : vector<1x192xf32> to vector<8x192xf32>
    %321 = arith.addf %319, %320 : vector<8x192xf32>
    %322 = vector.extract_strided_slice %317 {offsets = [0, 0], sizes = [8, 192], strides = [1, 1]} : vector<8x194xf32> to vector<8x192xf32>
    %323 = vector.extract_strided_slice %322 {offsets = [0, 0], sizes = [8, 64], strides = [1, 1]} : vector<8x192xf32> to vector<8x64xf32>
    %324 = vector.extract_strided_slice %321 {offsets = [0, 0], sizes = [8, 64], strides = [1, 1]} : vector<8x192xf32> to vector<8x64xf32>
    %325 = arith.addf %323, %324 : vector<8x64xf32>
    %326 = arith.negf %325 : vector<8x64xf32>
    %327 = math.exp %326 : vector<8x64xf32>
    %cst_70 = arith.constant 1.000000e+00 : f32
    %328 = vector.broadcast %cst_70 : f32 to vector<8x64xf32>
    %329 = arith.addf %328, %327 : vector<8x64xf32>
    %330 = arith.divf %328, %329 : vector<8x64xf32>
    %331 = vector.extract_strided_slice %322 {offsets = [0, 64], sizes = [8, 64], strides = [1, 1]} : vector<8x192xf32> to vector<8x64xf32>
    %332 = vector.extract_strided_slice %321 {offsets = [0, 64], sizes = [8, 64], strides = [1, 1]} : vector<8x192xf32> to vector<8x64xf32>
    %333 = arith.addf %331, %332 : vector<8x64xf32>
    %334 = arith.negf %333 : vector<8x64xf32>
    %335 = math.exp %334 : vector<8x64xf32>
    %cst_71 = arith.constant 1.000000e+00 : f32
    %336 = vector.broadcast %cst_71 : f32 to vector<8x64xf32>
    %337 = arith.addf %336, %335 : vector<8x64xf32>
    %338 = arith.divf %336, %337 : vector<8x64xf32>
    %339 = vector.extract_strided_slice %322 {offsets = [0, 128], sizes = [8, 64], strides = [1, 1]} : vector<8x192xf32> to vector<8x64xf32>
    %340 = vector.extract_strided_slice %321 {offsets = [0, 128], sizes = [8, 64], strides = [1, 1]} : vector<8x192xf32> to vector<8x64xf32>
    %341 = arith.mulf %330, %340 : vector<8x64xf32>
    %342 = arith.addf %339, %341 : vector<8x64xf32>
    %343 = math.tanh %342 : vector<8x64xf32>
    %cst_72 = arith.constant 1.000000e+00 : f32
    %344 = vector.broadcast %cst_72 : f32 to vector<8x64xf32>
    %345 = arith.subf %344, %338 : vector<8x64xf32>
    %346 = arith.mulf %345, %343 : vector<8x64xf32>
    %347 = arith.mulf %338, %313 : vector<8x64xf32>
    %348 = arith.addf %346, %347 : vector<8x64xf32>
    %349 = arith.truncf %348 : vector<8x64xf32> to vector<8x64xbf16>
    %cst_73 = arith.constant dense<0.000000e+00> : vector<8x194xf32>
    %350 = tpu.matmul %349, %8, %cst_73 {dimension_numbers = #tpu.dot_dimension_numbers<[1], [0], [0], [1], [0, 0, 1, 1], [], []>} : vector<8x64xbf16>, vector<64x194xbf16>, vector<8x194xf32> -> vector<8x194xf32>
    %351 = vector.broadcast %9 : vector<1x194xf32> to vector<8x194xf32>
    %352 = arith.addf %350, %351 : vector<8x194xf32>
    %353 = vector.extract_strided_slice %352 {offsets = [0, 192], sizes = [8, 2], strides = [1, 1]} : vector<8x194xf32> to vector<8x2xf32>
    %cst_74 = arith.constant dense<0.000000e+00> : vector<8x192xf32>
    %354 = tpu.matmul %349, %5, %cst_74 {dimension_numbers = #tpu.dot_dimension_numbers<[1], [0], [0], [1], [0, 0, 1, 1], [], []>} : vector<8x64xbf16>, vector<64x192xbf16>, vector<8x192xf32> -> vector<8x192xf32>
    %355 = vector.broadcast %7 : vector<1x192xf32> to vector<8x192xf32>
    %356 = arith.addf %354, %355 : vector<8x192xf32>
    %357 = vector.extract_strided_slice %352 {offsets = [0, 0], sizes = [8, 192], strides = [1, 1]} : vector<8x194xf32> to vector<8x192xf32>
    %358 = vector.extract_strided_slice %357 {offsets = [0, 0], sizes = [8, 64], strides = [1, 1]} : vector<8x192xf32> to vector<8x64xf32>
    %359 = vector.extract_strided_slice %356 {offsets = [0, 0], sizes = [8, 64], strides = [1, 1]} : vector<8x192xf32> to vector<8x64xf32>
    %360 = arith.addf %358, %359 : vector<8x64xf32>
    %361 = arith.negf %360 : vector<8x64xf32>
    %362 = math.exp %361 : vector<8x64xf32>
    %cst_75 = arith.constant 1.000000e+00 : f32
    %363 = vector.broadcast %cst_75 : f32 to vector<8x64xf32>
    %364 = arith.addf %363, %362 : vector<8x64xf32>
    %365 = arith.divf %363, %364 : vector<8x64xf32>
    %366 = vector.extract_strided_slice %357 {offsets = [0, 64], sizes = [8, 64], strides = [1, 1]} : vector<8x192xf32> to vector<8x64xf32>
    %367 = vector.extract_strided_slice %356 {offsets = [0, 64], sizes = [8, 64], strides = [1, 1]} : vector<8x192xf32> to vector<8x64xf32>
    %368 = arith.addf %366, %367 : vector<8x64xf32>
    %369 = arith.negf %368 : vector<8x64xf32>
    %370 = math.exp %369 : vector<8x64xf32>
    %cst_76 = arith.constant 1.000000e+00 : f32
    %371 = vector.broadcast %cst_76 : f32 to vector<8x64xf32>
    %372 = arith.addf %371, %370 : vector<8x64xf32>
    %373 = arith.divf %371, %372 : vector<8x64xf32>
    %374 = vector.extract_strided_slice %357 {offsets = [0, 128], sizes = [8, 64], strides = [1, 1]} : vector<8x192xf32> to vector<8x64xf32>
    %375 = vector.extract_strided_slice %356 {offsets = [0, 128], sizes = [8, 64], strides = [1, 1]} : vector<8x192xf32> to vector<8x64xf32>
    %376 = arith.mulf %365, %375 : vector<8x64xf32>
    %377 = arith.addf %374, %376 : vector<8x64xf32>
    %378 = math.tanh %377 : vector<8x64xf32>
    %cst_77 = arith.constant 1.000000e+00 : f32
    %379 = vector.broadcast %cst_77 : f32 to vector<8x64xf32>
    %380 = arith.subf %379, %373 : vector<8x64xf32>
    %381 = arith.mulf %380, %378 : vector<8x64xf32>
    %382 = arith.mulf %373, %348 : vector<8x64xf32>
    %383 = arith.addf %381, %382 : vector<8x64xf32>
    %384 = arith.truncf %383 : vector<8x64xf32> to vector<8x64xbf16>
    %cst_78 = arith.constant dense<0.000000e+00> : vector<8x194xf32>
    %385 = tpu.matmul %384, %8, %cst_78 {dimension_numbers = #tpu.dot_dimension_numbers<[1], [0], [0], [1], [0, 0, 1, 1], [], []>} : vector<8x64xbf16>, vector<64x194xbf16>, vector<8x194xf32> -> vector<8x194xf32>
    %386 = vector.broadcast %9 : vector<1x194xf32> to vector<8x194xf32>
    %387 = arith.addf %385, %386 : vector<8x194xf32>
    %388 = vector.extract_strided_slice %387 {offsets = [0, 192], sizes = [8, 2], strides = [1, 1]} : vector<8x194xf32> to vector<8x2xf32>
    %cst_79 = arith.constant dense<0.000000e+00> : vector<8x192xf32>
    %389 = tpu.matmul %384, %5, %cst_79 {dimension_numbers = #tpu.dot_dimension_numbers<[1], [0], [0], [1], [0, 0, 1, 1], [], []>} : vector<8x64xbf16>, vector<64x192xbf16>, vector<8x192xf32> -> vector<8x192xf32>
    %390 = vector.broadcast %7 : vector<1x192xf32> to vector<8x192xf32>
    %391 = arith.addf %389, %390 : vector<8x192xf32>
    %392 = vector.extract_strided_slice %387 {offsets = [0, 0], sizes = [8, 192], strides = [1, 1]} : vector<8x194xf32> to vector<8x192xf32>
    %393 = vector.extract_strided_slice %392 {offsets = [0, 0], sizes = [8, 64], strides = [1, 1]} : vector<8x192xf32> to vector<8x64xf32>
    %394 = vector.extract_strided_slice %391 {offsets = [0, 0], sizes = [8, 64], strides = [1, 1]} : vector<8x192xf32> to vector<8x64xf32>
    %395 = arith.addf %393, %394 : vector<8x64xf32>
    %396 = arith.negf %395 : vector<8x64xf32>
    %397 = math.exp %396 : vector<8x64xf32>
    %cst_80 = arith.constant 1.000000e+00 : f32
    %398 = vector.broadcast %cst_80 : f32 to vector<8x64xf32>
    %399 = arith.addf %398, %397 : vector<8x64xf32>
    %400 = arith.divf %398, %399 : vector<8x64xf32>
    %401 = vector.extract_strided_slice %392 {offsets = [0, 64], sizes = [8, 64], strides = [1, 1]} : vector<8x192xf32> to vector<8x64xf32>
    %402 = vector.extract_strided_slice %391 {offsets = [0, 64], sizes = [8, 64], strides = [1, 1]} : vector<8x192xf32> to vector<8x64xf32>
    %403 = arith.addf %401, %402 : vector<8x64xf32>
    %404 = arith.negf %403 : vector<8x64xf32>
    %405 = math.exp %404 : vector<8x64xf32>
    %cst_81 = arith.constant 1.000000e+00 : f32
    %406 = vector.broadcast %cst_81 : f32 to vector<8x64xf32>
    %407 = arith.addf %406, %405 : vector<8x64xf32>
    %408 = arith.divf %406, %407 : vector<8x64xf32>
    %409 = vector.extract_strided_slice %392 {offsets = [0, 128], sizes = [8, 64], strides = [1, 1]} : vector<8x192xf32> to vector<8x64xf32>
    %410 = vector.extract_strided_slice %391 {offsets = [0, 128], sizes = [8, 64], strides = [1, 1]} : vector<8x192xf32> to vector<8x64xf32>
    %411 = arith.mulf %400, %410 : vector<8x64xf32>
    %412 = arith.addf %409, %411 : vector<8x64xf32>
    %413 = math.tanh %412 : vector<8x64xf32>
    %cst_82 = arith.constant 1.000000e+00 : f32
    %414 = vector.broadcast %cst_82 : f32 to vector<8x64xf32>
    %415 = arith.subf %414, %408 : vector<8x64xf32>
    %416 = arith.mulf %415, %413 : vector<8x64xf32>
    %417 = arith.mulf %408, %383 : vector<8x64xf32>
    %418 = arith.addf %416, %417 : vector<8x64xf32>
    %419 = arith.truncf %418 : vector<8x64xf32> to vector<8x64xbf16>
    %cst_83 = arith.constant dense<0.000000e+00> : vector<8x194xf32>
    %420 = tpu.matmul %419, %8, %cst_83 {dimension_numbers = #tpu.dot_dimension_numbers<[1], [0], [0], [1], [0, 0, 1, 1], [], []>} : vector<8x64xbf16>, vector<64x194xbf16>, vector<8x194xf32> -> vector<8x194xf32>
    %421 = vector.broadcast %9 : vector<1x194xf32> to vector<8x194xf32>
    %422 = arith.addf %420, %421 : vector<8x194xf32>
    %423 = vector.extract_strided_slice %422 {offsets = [0, 192], sizes = [8, 2], strides = [1, 1]} : vector<8x194xf32> to vector<8x2xf32>
    %cst_84 = arith.constant dense<0.000000e+00> : vector<8x192xf32>
    %424 = tpu.matmul %419, %5, %cst_84 {dimension_numbers = #tpu.dot_dimension_numbers<[1], [0], [0], [1], [0, 0, 1, 1], [], []>} : vector<8x64xbf16>, vector<64x192xbf16>, vector<8x192xf32> -> vector<8x192xf32>
    %425 = vector.broadcast %7 : vector<1x192xf32> to vector<8x192xf32>
    %426 = arith.addf %424, %425 : vector<8x192xf32>
    %427 = vector.extract_strided_slice %422 {offsets = [0, 0], sizes = [8, 192], strides = [1, 1]} : vector<8x194xf32> to vector<8x192xf32>
    %428 = vector.extract_strided_slice %427 {offsets = [0, 0], sizes = [8, 64], strides = [1, 1]} : vector<8x192xf32> to vector<8x64xf32>
    %429 = vector.extract_strided_slice %426 {offsets = [0, 0], sizes = [8, 64], strides = [1, 1]} : vector<8x192xf32> to vector<8x64xf32>
    %430 = arith.addf %428, %429 : vector<8x64xf32>
    %431 = arith.negf %430 : vector<8x64xf32>
    %432 = math.exp %431 : vector<8x64xf32>
    %cst_85 = arith.constant 1.000000e+00 : f32
    %433 = vector.broadcast %cst_85 : f32 to vector<8x64xf32>
    %434 = arith.addf %433, %432 : vector<8x64xf32>
    %435 = arith.divf %433, %434 : vector<8x64xf32>
    %436 = vector.extract_strided_slice %427 {offsets = [0, 64], sizes = [8, 64], strides = [1, 1]} : vector<8x192xf32> to vector<8x64xf32>
    %437 = vector.extract_strided_slice %426 {offsets = [0, 64], sizes = [8, 64], strides = [1, 1]} : vector<8x192xf32> to vector<8x64xf32>
    %438 = arith.addf %436, %437 : vector<8x64xf32>
    %439 = arith.negf %438 : vector<8x64xf32>
    %440 = math.exp %439 : vector<8x64xf32>
    %cst_86 = arith.constant 1.000000e+00 : f32
    %441 = vector.broadcast %cst_86 : f32 to vector<8x64xf32>
    %442 = arith.addf %441, %440 : vector<8x64xf32>
    %443 = arith.divf %441, %442 : vector<8x64xf32>
    %444 = vector.extract_strided_slice %427 {offsets = [0, 128], sizes = [8, 64], strides = [1, 1]} : vector<8x192xf32> to vector<8x64xf32>
    %445 = vector.extract_strided_slice %426 {offsets = [0, 128], sizes = [8, 64], strides = [1, 1]} : vector<8x192xf32> to vector<8x64xf32>
    %446 = arith.mulf %435, %445 : vector<8x64xf32>
    %447 = arith.addf %444, %446 : vector<8x64xf32>
    %448 = math.tanh %447 : vector<8x64xf32>
    %cst_87 = arith.constant 1.000000e+00 : f32
    %449 = vector.broadcast %cst_87 : f32 to vector<8x64xf32>
    %450 = arith.subf %449, %443 : vector<8x64xf32>
    %451 = arith.mulf %450, %448 : vector<8x64xf32>
    %452 = arith.mulf %443, %418 : vector<8x64xf32>
    %453 = arith.addf %451, %452 : vector<8x64xf32>
    %454 = arith.truncf %453 : vector<8x64xf32> to vector<8x64xbf16>
    %cst_88 = arith.constant dense<0.000000e+00> : vector<8x194xf32>
    %455 = tpu.matmul %454, %8, %cst_88 {dimension_numbers = #tpu.dot_dimension_numbers<[1], [0], [0], [1], [0, 0, 1, 1], [], []>} : vector<8x64xbf16>, vector<64x194xbf16>, vector<8x194xf32> -> vector<8x194xf32>
    %456 = vector.broadcast %9 : vector<1x194xf32> to vector<8x194xf32>
    %457 = arith.addf %455, %456 : vector<8x194xf32>
    %458 = vector.extract_strided_slice %457 {offsets = [0, 192], sizes = [8, 2], strides = [1, 1]} : vector<8x194xf32> to vector<8x2xf32>
    %cst_89 = arith.constant dense<0.000000e+00> : vector<8x192xf32>
    %459 = tpu.matmul %454, %5, %cst_89 {dimension_numbers = #tpu.dot_dimension_numbers<[1], [0], [0], [1], [0, 0, 1, 1], [], []>} : vector<8x64xbf16>, vector<64x192xbf16>, vector<8x192xf32> -> vector<8x192xf32>
    %460 = vector.broadcast %7 : vector<1x192xf32> to vector<8x192xf32>
    %461 = arith.addf %459, %460 : vector<8x192xf32>
    %462 = vector.extract_strided_slice %457 {offsets = [0, 0], sizes = [8, 192], strides = [1, 1]} : vector<8x194xf32> to vector<8x192xf32>
    %463 = vector.extract_strided_slice %462 {offsets = [0, 0], sizes = [8, 64], strides = [1, 1]} : vector<8x192xf32> to vector<8x64xf32>
    %464 = vector.extract_strided_slice %461 {offsets = [0, 0], sizes = [8, 64], strides = [1, 1]} : vector<8x192xf32> to vector<8x64xf32>
    %465 = arith.addf %463, %464 : vector<8x64xf32>
    %466 = arith.negf %465 : vector<8x64xf32>
    %467 = math.exp %466 : vector<8x64xf32>
    %cst_90 = arith.constant 1.000000e+00 : f32
    %468 = vector.broadcast %cst_90 : f32 to vector<8x64xf32>
    %469 = arith.addf %468, %467 : vector<8x64xf32>
    %470 = arith.divf %468, %469 : vector<8x64xf32>
    %471 = vector.extract_strided_slice %462 {offsets = [0, 64], sizes = [8, 64], strides = [1, 1]} : vector<8x192xf32> to vector<8x64xf32>
    %472 = vector.extract_strided_slice %461 {offsets = [0, 64], sizes = [8, 64], strides = [1, 1]} : vector<8x192xf32> to vector<8x64xf32>
    %473 = arith.addf %471, %472 : vector<8x64xf32>
    %474 = arith.negf %473 : vector<8x64xf32>
    %475 = math.exp %474 : vector<8x64xf32>
    %cst_91 = arith.constant 1.000000e+00 : f32
    %476 = vector.broadcast %cst_91 : f32 to vector<8x64xf32>
    %477 = arith.addf %476, %475 : vector<8x64xf32>
    %478 = arith.divf %476, %477 : vector<8x64xf32>
    %479 = vector.extract_strided_slice %462 {offsets = [0, 128], sizes = [8, 64], strides = [1, 1]} : vector<8x192xf32> to vector<8x64xf32>
    %480 = vector.extract_strided_slice %461 {offsets = [0, 128], sizes = [8, 64], strides = [1, 1]} : vector<8x192xf32> to vector<8x64xf32>
    %481 = arith.mulf %470, %480 : vector<8x64xf32>
    %482 = arith.addf %479, %481 : vector<8x64xf32>
    %483 = math.tanh %482 : vector<8x64xf32>
    %cst_92 = arith.constant 1.000000e+00 : f32
    %484 = vector.broadcast %cst_92 : f32 to vector<8x64xf32>
    %485 = arith.subf %484, %478 : vector<8x64xf32>
    %486 = arith.mulf %485, %483 : vector<8x64xf32>
    %487 = arith.mulf %478, %453 : vector<8x64xf32>
    %488 = arith.addf %486, %487 : vector<8x64xf32>
    %489 = arith.truncf %488 : vector<8x64xf32> to vector<8x64xbf16>
    %cst_93 = arith.constant dense<0.000000e+00> : vector<8x194xf32>
    %490 = tpu.matmul %489, %8, %cst_93 {dimension_numbers = #tpu.dot_dimension_numbers<[1], [0], [0], [1], [0, 0, 1, 1], [], []>} : vector<8x64xbf16>, vector<64x194xbf16>, vector<8x194xf32> -> vector<8x194xf32>
    %491 = vector.broadcast %9 : vector<1x194xf32> to vector<8x194xf32>
    %492 = arith.addf %490, %491 : vector<8x194xf32>
    %493 = vector.extract_strided_slice %492 {offsets = [0, 192], sizes = [8, 2], strides = [1, 1]} : vector<8x194xf32> to vector<8x2xf32>
    %cst_94 = arith.constant dense<0.000000e+00> : vector<8x192xf32>
    %494 = tpu.matmul %489, %5, %cst_94 {dimension_numbers = #tpu.dot_dimension_numbers<[1], [0], [0], [1], [0, 0, 1, 1], [], []>} : vector<8x64xbf16>, vector<64x192xbf16>, vector<8x192xf32> -> vector<8x192xf32>
    %495 = vector.broadcast %7 : vector<1x192xf32> to vector<8x192xf32>
    %496 = arith.addf %494, %495 : vector<8x192xf32>
    %497 = vector.extract_strided_slice %492 {offsets = [0, 0], sizes = [8, 192], strides = [1, 1]} : vector<8x194xf32> to vector<8x192xf32>
    %498 = vector.extract_strided_slice %497 {offsets = [0, 0], sizes = [8, 64], strides = [1, 1]} : vector<8x192xf32> to vector<8x64xf32>
    %499 = vector.extract_strided_slice %496 {offsets = [0, 0], sizes = [8, 64], strides = [1, 1]} : vector<8x192xf32> to vector<8x64xf32>
    %500 = arith.addf %498, %499 : vector<8x64xf32>
    %501 = arith.negf %500 : vector<8x64xf32>
    %502 = math.exp %501 : vector<8x64xf32>
    %cst_95 = arith.constant 1.000000e+00 : f32
    %503 = vector.broadcast %cst_95 : f32 to vector<8x64xf32>
    %504 = arith.addf %503, %502 : vector<8x64xf32>
    %505 = arith.divf %503, %504 : vector<8x64xf32>
    %506 = vector.extract_strided_slice %497 {offsets = [0, 64], sizes = [8, 64], strides = [1, 1]} : vector<8x192xf32> to vector<8x64xf32>
    %507 = vector.extract_strided_slice %496 {offsets = [0, 64], sizes = [8, 64], strides = [1, 1]} : vector<8x192xf32> to vector<8x64xf32>
    %508 = arith.addf %506, %507 : vector<8x64xf32>
    %509 = arith.negf %508 : vector<8x64xf32>
    %510 = math.exp %509 : vector<8x64xf32>
    %cst_96 = arith.constant 1.000000e+00 : f32
    %511 = vector.broadcast %cst_96 : f32 to vector<8x64xf32>
    %512 = arith.addf %511, %510 : vector<8x64xf32>
    %513 = arith.divf %511, %512 : vector<8x64xf32>
    %514 = vector.extract_strided_slice %497 {offsets = [0, 128], sizes = [8, 64], strides = [1, 1]} : vector<8x192xf32> to vector<8x64xf32>
    %515 = vector.extract_strided_slice %496 {offsets = [0, 128], sizes = [8, 64], strides = [1, 1]} : vector<8x192xf32> to vector<8x64xf32>
    %516 = arith.mulf %505, %515 : vector<8x64xf32>
    %517 = arith.addf %514, %516 : vector<8x64xf32>
    %518 = math.tanh %517 : vector<8x64xf32>
    %cst_97 = arith.constant 1.000000e+00 : f32
    %519 = vector.broadcast %cst_97 : f32 to vector<8x64xf32>
    %520 = arith.subf %519, %513 : vector<8x64xf32>
    %521 = arith.mulf %520, %518 : vector<8x64xf32>
    %522 = arith.mulf %513, %488 : vector<8x64xf32>
    %523 = arith.addf %521, %522 : vector<8x64xf32>
    %524 = arith.truncf %523 : vector<8x64xf32> to vector<8x64xbf16>
    %cst_98 = arith.constant dense<0.000000e+00> : vector<8x194xf32>
    %525 = tpu.matmul %524, %8, %cst_98 {dimension_numbers = #tpu.dot_dimension_numbers<[1], [0], [0], [1], [0, 0, 1, 1], [], []>} : vector<8x64xbf16>, vector<64x194xbf16>, vector<8x194xf32> -> vector<8x194xf32>
    %526 = vector.broadcast %9 : vector<1x194xf32> to vector<8x194xf32>
    %527 = arith.addf %525, %526 : vector<8x194xf32>
    %528 = vector.extract_strided_slice %527 {offsets = [0, 192], sizes = [8, 2], strides = [1, 1]} : vector<8x194xf32> to vector<8x2xf32>
    %cst_99 = arith.constant dense<0.000000e+00> : vector<8x192xf32>
    %529 = tpu.matmul %524, %5, %cst_99 {dimension_numbers = #tpu.dot_dimension_numbers<[1], [0], [0], [1], [0, 0, 1, 1], [], []>} : vector<8x64xbf16>, vector<64x192xbf16>, vector<8x192xf32> -> vector<8x192xf32>
    %530 = vector.broadcast %7 : vector<1x192xf32> to vector<8x192xf32>
    %531 = arith.addf %529, %530 : vector<8x192xf32>
    %532 = vector.extract_strided_slice %527 {offsets = [0, 0], sizes = [8, 192], strides = [1, 1]} : vector<8x194xf32> to vector<8x192xf32>
    %533 = vector.extract_strided_slice %532 {offsets = [0, 0], sizes = [8, 64], strides = [1, 1]} : vector<8x192xf32> to vector<8x64xf32>
    %534 = vector.extract_strided_slice %531 {offsets = [0, 0], sizes = [8, 64], strides = [1, 1]} : vector<8x192xf32> to vector<8x64xf32>
    %535 = arith.addf %533, %534 : vector<8x64xf32>
    %536 = arith.negf %535 : vector<8x64xf32>
    %537 = math.exp %536 : vector<8x64xf32>
    %cst_100 = arith.constant 1.000000e+00 : f32
    %538 = vector.broadcast %cst_100 : f32 to vector<8x64xf32>
    %539 = arith.addf %538, %537 : vector<8x64xf32>
    %540 = arith.divf %538, %539 : vector<8x64xf32>
    %541 = vector.extract_strided_slice %532 {offsets = [0, 64], sizes = [8, 64], strides = [1, 1]} : vector<8x192xf32> to vector<8x64xf32>
    %542 = vector.extract_strided_slice %531 {offsets = [0, 64], sizes = [8, 64], strides = [1, 1]} : vector<8x192xf32> to vector<8x64xf32>
    %543 = arith.addf %541, %542 : vector<8x64xf32>
    %544 = arith.negf %543 : vector<8x64xf32>
    %545 = math.exp %544 : vector<8x64xf32>
    %cst_101 = arith.constant 1.000000e+00 : f32
    %546 = vector.broadcast %cst_101 : f32 to vector<8x64xf32>
    %547 = arith.addf %546, %545 : vector<8x64xf32>
    %548 = arith.divf %546, %547 : vector<8x64xf32>
    %549 = vector.extract_strided_slice %532 {offsets = [0, 128], sizes = [8, 64], strides = [1, 1]} : vector<8x192xf32> to vector<8x64xf32>
    %550 = vector.extract_strided_slice %531 {offsets = [0, 128], sizes = [8, 64], strides = [1, 1]} : vector<8x192xf32> to vector<8x64xf32>
    %551 = arith.mulf %540, %550 : vector<8x64xf32>
    %552 = arith.addf %549, %551 : vector<8x64xf32>
    %553 = math.tanh %552 : vector<8x64xf32>
    %cst_102 = arith.constant 1.000000e+00 : f32
    %554 = vector.broadcast %cst_102 : f32 to vector<8x64xf32>
    %555 = arith.subf %554, %548 : vector<8x64xf32>
    %556 = arith.mulf %555, %553 : vector<8x64xf32>
    %557 = arith.mulf %548, %523 : vector<8x64xf32>
    %558 = arith.addf %556, %557 : vector<8x64xf32>
    %559 = arith.truncf %558 : vector<8x64xf32> to vector<8x64xbf16>
    %cst_103 = arith.constant dense<0.000000e+00> : vector<8x2xf32>
    %560 = tpu.matmul %559, %10, %cst_103 {dimension_numbers = #tpu.dot_dimension_numbers<[1], [0], [0], [1], [0, 0, 1, 1], [], []>} : vector<8x64xbf16>, vector<64x2xbf16>, vector<8x2xf32> -> vector<8x2xf32>
    %561 = vector.broadcast %11 : vector<1x2xf32> to vector<8x2xf32>
    %562 = arith.addf %560, %561 : vector<8x2xf32>
    %563 = tpu.concatenate %318, %353, %388, %423, %458, %493, %528, %562 in 1 : vector<8x2xf32>, vector<8x2xf32>, vector<8x2xf32>, vector<8x2xf32>, vector<8x2xf32>, vector<8x2xf32>, vector<8x2xf32>, vector<8x2xf32> -> vector<8x16xf32>
    %c0_104 = arith.constant 0 : index
    %c0_105 = arith.constant 0 : index
    %564 = vector.load %arg15[%c0_104, %c0_105] : memref<8x16xf32, #tpu.memory_space<vmem>>, vector<8x16xf32>
    tpu.vector_store %arg15[%c0_104, %c0_105], %563 {strides = array<i32>} : memref<8x16xf32, #tpu.memory_space<vmem>>, vector<8x16xf32>,
    return
  }
  func.func @transform_0(%arg0: i32) -> (i32, i32, i32) {
    %c0_i32 = arith.constant 0 : i32
    %c0_i32_0 = arith.constant 0 : i32
    %c0_i32_1 = arith.constant 0 : i32
    return %c0_i32, %arg0, %c0_i32_0 : i32, i32, i32
  }
  func.func @transform_1(%arg0: i32) -> (i32, i32) {
    %c0_i32 = arith.constant 0 : i32
    %c0_i32_0 = arith.constant 0 : i32
    return %arg0, %c0_i32 : i32, i32
  }
  func.func @transform_2(%arg0: i32) -> (i32, i32) {
    %c0_i32 = arith.constant 0 : i32
    %c0_i32_0 = arith.constant 0 : i32
    %c0_i32_1 = arith.constant 0 : i32
    return %c0_i32, %c0_i32_0 : i32, i32
  }
  func.func @transform_3(%arg0: i32) -> (i32, i32) {
    %c0_i32 = arith.constant 0 : i32
    %c0_i32_0 = arith.constant 0 : i32
    %c0_i32_1 = arith.constant 0 : i32
    return %c0_i32, %c0_i32_0 : i32, i32
  }
  func.func @transform_4(%arg0: i32) -> (i32, i32) {
    %c0_i32 = arith.constant 0 : i32
    %c0_i32_0 = arith.constant 0 : i32
    %c0_i32_1 = arith.constant 0 : i32
    return %c0_i32, %c0_i32_0 : i32, i32
  }
  func.func @transform_5(%arg0: i32) -> (i32, i32) {
    %c0_i32 = arith.constant 0 : i32
    %c0_i32_0 = arith.constant 0 : i32
    %c0_i32_1 = arith.constant 0 : i32
    return %c0_i32, %c0_i32_0 : i32, i32
  }
  func.func @transform_6(%arg0: i32) -> (i32, i32) {
    %c0_i32 = arith.constant 0 : i32
    %c0_i32_0 = arith.constant 0 : i32
    %c0_i32_1 = arith.constant 0 : i32
    return %c0_i32, %c0_i32_0 : i32, i32
  }
  func.func @transform_7(%arg0: i32) -> (i32, i32) {
    %c0_i32 = arith.constant 0 : i32
    %c0_i32_0 = arith.constant 0 : i32
    %c0_i32_1 = arith.constant 0 : i32
    return %c0_i32, %c0_i32_0 : i32, i32
  }
  func.func @transform_8(%arg0: i32) -> (i32, i32) {
    %c0_i32 = arith.constant 0 : i32
    %c0_i32_0 = arith.constant 0 : i32
    %c0_i32_1 = arith.constant 0 : i32
    return %c0_i32, %c0_i32_0 : i32, i32
  }
  func.func @transform_9(%arg0: i32) -> (i32, i32) {
    %c0_i32 = arith.constant 0 : i32
    %c0_i32_0 = arith.constant 0 : i32
    %c0_i32_1 = arith.constant 0 : i32
    return %c0_i32, %c0_i32_0 : i32, i32
  }
  func.func @transform_10(%arg0: i32) -> (i32, i32) {
    %c0_i32 = arith.constant 0 : i32
    %c0_i32_0 = arith.constant 0 : i32
    %c0_i32_1 = arith.constant 0 : i32
    return %c0_i32, %c0_i32_0 : i32, i32
  }
  func.func @transform_11(%arg0: i32) -> (i32, i32) {
    %c0_i32 = arith.constant 0 : i32
    %c0_i32_0 = arith.constant 0 : i32
    %c0_i32_1 = arith.constant 0 : i32
    return %c0_i32, %c0_i32_0 : i32, i32
  }
  func.func @transform_12(%arg0: i32) -> (i32, i32) {
    %c0_i32 = arith.constant 0 : i32
    %c0_i32_0 = arith.constant 0 : i32
    %c0_i32_1 = arith.constant 0 : i32
    return %c0_i32, %c0_i32_0 : i32, i32
  }
  func.func @transform_13(%arg0: i32) -> (i32, i32) {
    %c0_i32 = arith.constant 0 : i32
    %c0_i32_0 = arith.constant 0 : i32
    %c0_i32_1 = arith.constant 0 : i32
    return %c0_i32, %c0_i32_0 : i32, i32
  }
  func.func @transform_14(%arg0: i32) -> (i32, i32) {
    %c0_i32 = arith.constant 0 : i32
    %c0_i32_0 = arith.constant 0 : i32
    return %arg0, %c0_i32 : i32, i32
  }
}

</mosaic_0001>

<bundles_post_ra>
// kernel: fed_node_predictor_forward.1
= control target key start
LH: loop header
LB: loop body
LE: loop exit
PB: predicated region body
PF: predicated region fallthrough
CT: control target
= control target key end

     0   :  { %vm139_vm0 = vcmask 1040384   ;;  %v2292_v0 = vmov 0.0   ;;  %vm2293_vm1 = vmmov 0   ;;  %vm126_vm2 = vcmask 15360   ;;  %s2295_s27 = smov 64   ;;  %s2298_s19 = smov 32   ;;  %s2937_s3 = inlined_call_operand.vmem [shape: bf16[32,96], index: 3, kind: input, shape index: {}]   ;;  %s2938_s2 = inlined_call_operand.vmem [shape: bf16[2,96], index: 2, kind: input, shape index: {}]   ;;  %s2939_s0 = inlined_call_operand.vmem [shape: f32[8,8,2], index: 0, kind: input, shape index: {}]   ;;  %s2940_s5 = inlined_call_operand.vmem [shape: f32[1,96], index: 5, kind: input, shape index: {}]   ;;  %s2941_s4 = inlined_call_operand.vmem [shape: f32[1,96], index: 4, kind: input, shape index: {}]   ;;  %s2942_s7 = inlined_call_operand.vmem [shape: bf16[64,192], index: 7, kind: input, shape index: {}]   ;;  %s2943_s6 = inlined_call_operand.vmem [shape: bf16[2,192], index: 6, kind: input, shape index: {}]   ;;  %s2944_s1 = inlined_call_operand.vmem [shape: f32[8,32], index: 1, kind: input, shape index: {}]   ;;  %s2945_s8 = inlined_call_operand.vmem [shape: f32[1,192], index: 8, kind: input, shape index: {}]   ;;  %s2946_s9 = inlined_call_operand.vmem [shape: f32[1,192], index: 9, kind: input, shape index: {}]   ;;  %s2947_s10 = inlined_call_operand.vmem [shape: bf16[64,194], index: 10, kind: input, shape index: {}]   ;;  %s2948_s11 = inlined_call_operand.vmem [shape: f32[1,194], index: 11, kind: input, shape index: {}]   ;;  %s2949_s12 = inlined_call_operand.vmem [shape: bf16[64,2], index: 12, kind: input, shape index: {}]   ;;  %s2950_s13 = inlined_call_operand.vmem [shape: f32[1,2], index: 13, kind: input, shape index: {}]   ;;  %s2951_s14 = inlined_call_operand.vmem [shape: f32[8,16], index: 14, kind: output, shape index: {}]  }
   0x1   :  { %2075 = vmatprep.subr.bf16.mxu1 %v2292_v0  ;;  %v2385_v1 = vld [vmem:[%s2937_s3] sm:$0xff]   ;;  %2079 = vmatprep.mubr.msk.bf16.mxu1 %vm2293_vm1, %v2292_v0  ;;  %v2398_v4 = vld [vmem:[%s2937_s3 + $0x8] sm:$0xff]   ;;  %v86_v8 = vld [vmem:[%s2939_s0 + $0x10] sm:$0xff]  ;;  %v2294_v11 = vmov 0   ;;  %vm226_vm3 = vcmask 261120   ;;  %vm956_vm4 = vcmask 523264  }
   0x2   :  { %v48_v2 = vld [vmem:[%s2938_s2] sm:$0x1]  ;;  %2076 = vmatpush3.bf16.msra.mxu1 %v2385_v1  ;;  %v85_v6 = vld [vmem:[%s2939_s0 + $0x8] sm:$0xff]  ;;  %v87_v9 = vld [vmem:[%s2939_s0 + $0x18] sm:$0xff]  ;;  %s2301_s21 = smov 76   ;;  %s2302_s22 = smov 66  }
   0x3   :  { %2151 = vmatprep.subr.msk.bf16.mxu0 %vm139_vm0, %v48_v2  ;;  %v141_v3 = vsel %vm139_vm0, %v48_v2, 0  ;;  %v84_v5 = vld [vmem:[%s2939_s0] sm:$0xff]  ;;  %2077 = vmatprep.subr.bf16.mxu1 %v2292_v0  ;;  %v2028_v10 = vpack.c.bf16 %v87_v9, %v86_v8  ;;  %v89_v57 = vld [vmem:[%s2939_s0 + $0x28] sm:$0xff]  ;;  %v90_v58 = vld [vmem:[%s2939_s0 + $0x30] sm:$0xff]  ;;  %s2303_s2 = smov 70   ;;  %s2304_s23 = smov 74  }
   0x4   :  { %2066 = vmatpush3.bf16.msra.mxu0 %v141_v3  ;;  %v2027_v7 = vpack.c.bf16 %v85_v6, %v84_v5  ;;  %v2434_v14 = vld [vmem:[%s2940_s5] ss:$0 sm:$0xff]  ;;  %s2296_s5 = smov 96   ;;  %v2472_v60 = vld [vmem:[%s2939_s0 + $0x38] sm:$0xff]  ;;  %vm1933_vm5 = vcmask 31744   ;;  %vm1935_vm6 = vcmask 48128  }
   0x5   :  { %2091 = vmatprep.subr.bf16.mxu0 %v2292_v0  ;;  %v2443_v22 = vld [vmem:[%s2941_s4] ss:$0 sm:$0xff]  ;;  %v2030_v61 = vpack.c.bf16 %v2472_v60, %v90_v58  ;;  %vm1937_vm7 = vcmask 64512   ;;  %vm1939_vm8 = vcmask 80896   ;;  %vm1941_vm9 = vcmask 97280  }
   0x6   :  { %2067 = vmatprep.mubr.msk.bf16.mxu0 %vm126_vm2, %v2027_v7  ;;  %2078 = vmatpush3.bf16.msra.mxu1 %v2398_v4  ;;  %v88_v56 = vld [vmem:[%s2939_s0 + $0x20] sm:$0xff]  ;;  %vm1943_vm10 = vcmask 113664   ;;  %vm1945_vm11 = vcmask 130048  }
   0x7   :  { %2068 = vmatmul.mubr.msk.bf16.vlgmr.msra.gmra.mrb[0].mxu0 %vm126_vm2, %v2028_v10  ;;  %2083 = vmatprep.subr.bf16.mxu1 %v2292_v0  ;;  %v2029_v59 = vpack.c.bf16 %v89_v57, %v88_v56 }
   0x8   :  { %2092 = vmatpush3.bf16.msra.mxu0 %v2385_v1 }
   0x9   :  { %2093 = vmatprep.subr.bf16.mxu0 %v2292_v0  ;;  %2080 = vmatmul.mubr.bf16.vlgmr.msra.gmra.mrb[0].mxu1 %v2294_v11 }
   0xa   :  { %2084 = vmatpush3.bf16.msra.mxu1 %v2385_v1  ;;  %2087 = vmatprep.mubr.msk.bf16.mxu1 %vm2293_vm1, %v2292_v0 }
   0xb   :  { %2085 = vmatprep.subr.bf16.mxu1 %v2292_v0  ;;  %2071 = vmatprep.mubr.msk.bf16.mxu0 %vm126_vm2, %v2029_v59 }
   0xc   :  { %2094 = vmatpush3.bf16.msra.mxu0 %v2398_v4 }
   0xd   :  { %2107 = vmatprep.subr.bf16.mxu0 %v2292_v0 }
   0xe   :  { %2086 = vmatpush3.bf16.msra.mxu1 %v2398_v4 }
   0xf   :  { %2099 = vmatprep.subr.bf16.mxu1 %v2292_v0  ;;  %2072 = vmatmul.mubr.msk.bf16.gmra.mrb[4].mxu0 %vm126_vm2, %v2030_v61 }
  0x10   :  { %2095 = vmatprep.mubr.msk.bf16.mxu0 %vm2293_vm1, %v2292_v0 }
  0xda   :  { %v2429_v12 = vpop.f32.mrb[0].mxu0 }
  0xdb   :  { %v177_v13 = vpop.f32.mrb[1].mxu0 }
  0xdc   :  { %v2436_v15 = vpop.f32.mrb[2].mxu0  ;;  %v264_v16 = vpop.f32.mrb[0].mxu1  ;;  %v178_v23 = vadd.f32 %v2443_v22, %v177_v13 }
  0xdd   :  { %v180_v17 = vpop.f32.mrb[3].mxu0  ;;  %v265_v18 = vadd.f32 %v2434_v14, %v264_v16  ;;  %v2081_v19 = vpop.f32.mrb[1].mxu1 }
  0xde   :  { %v267_v20 = vpop.f32.mrb[2].mxu1  ;;  %v181_v46 = vadd.f32 %v2443_v22, %v180_v17 }
  0xdf   :  { %278 = vrot.lane.b32.xlu0 %v265_v18, %s2295_s27  ;;  %v2082_v21 = vpop.f32.mrb[3].mxu1  ;;  %v270_v24 = vadd.f32 %v265_v18, %v178_v23 }
  0xe1   :  { %v1963_v25 = vmul.f32 -1.442695, %v270_v24 }
  0xe2   :  { %v2481_v8 = vpop.f32.mrb[4].mxu0 }
  0xe3   :  { %2196 = vpow2.f32 %v1963_v25  ;;  %v2483_v9 = vpop.f32.mrb[5].mxu0 }
  0xe4   :  { %v2485_v10 = vpop.f32.mrb[6].mxu0 }
  0xe5   :  { %v2487_v13 = vpop.f32.mrb[7].mxu0 }
  0xed   :  { %v2197_v26 = vpop.eup %2196 }
  0xee   :  { %v274_v27 = vadd.f32 1.0, %v2197_v26 }
  0xf0   :  { %2198 = vrcp.f32 %v274_v27 }
  0xfa   :  { %v2199_v28 = vpop.eup %2198 }
  0xfb   :  { %v288_v34 = vsub.f32 1.0, %v2199_v28  ;;  %v294_v36 = vmul.f32 0.0, %v2199_v28 }
 0x151   :  { %v279_v29 = vpop.permute.xlu0 %278 }
 0x152   :  { %v281_v30 = vmul.f32 %v2199_v28, %v279_v29 }
 0x154   :  { %283 = vrot.lane.b32.xlu0 %v281_v30, %s2295_s27 }
 0x1c6   :  { %v284_v31 = vpop.permute.xlu0 %283 }
 0x1c7   :  { %v286_v32 = vadd.f32 %v284_v31, %v178_v23  ;;  %v186_v23 = vadd.f32 %v2429_v12, %v2443_v22 }
 0x1c9   :  { %2200 = vtanh.f32 %v286_v32 }
 0x1d3   :  { %v2201_v33 = vpop.eup %2200 }
 0x1d4   :  { %290 = vrot.lane.b32.xlu1 %v2201_v33, %s2296_s5 }
 0x246   :  { %v291_v35 = vpop.permute.xlu1 %290 }
 0x247   :  { %v293_v37 = vmul.f32 %v291_v35, %v288_v34 }
 0x249   :  { %v295_v38 = vadd.f32 %v294_v36, %v293_v37 }
 0x24b   :  { %v296_v39 = vpack.c.bf16 %v295_v38, %v295_v38 }
 0x24d   :  { %298 = vrot.lane.b32.xlu1 %v296_v39, %s2296_s5 }
 0x2bf   :  { %v299_v40 = vpop.permute.xlu1 %298 }
 0x2c0   :  { %2088 = vmatmul.mubr.msk.bf16.vlgmr.msra.gmra.mrb[4].mxu1 %vm226_vm3, %v299_v40 }
 0x2c1   :  { %2100 = vmatpush3.bf16.msra.mxu1 %v2385_v1  ;;  %2103 = vmatprep.mubr.msk.bf16.mxu1 %vm2293_vm1, %v2292_v0 }
 0x2c2   :  { %2101 = vmatprep.subr.bf16.mxu1 %v2292_v0 }
 0x2c5   :  { %2102 = vmatpush3.bf16.msra.mxu1 %v2398_v4 }
 0x2c6   :  { %2115 = vmatprep.subr.bf16.mxu1 %v2292_v0 }
 0x393   :  { %v337_v41 = vpop.f32.mrb[4].mxu1 }
 0x394   :  { %v338_v42 = vadd.f32 %v2434_v14, %v337_v41  ;;  %v2089_v43 = vpop.f32.mrb[5].mxu1 }
 0x395   :  { %v340_v44 = vpop.f32.mrb[6].mxu1 }
 0x396   :  { %351 = vrot.lane.b32.xlu0 %v338_v42, %s2295_s27  ;;  %v2090_v45 = vpop.f32.mrb[7].mxu1  ;;  %v343_v47 = vadd.f32 %v338_v42, %v181_v46 }
 0x397   :  { %v189_v45 = vadd.f32 %v2436_v15, %v2443_v22 }
 0x398   :  { %v1965_v48 = vmul.f32 -1.442695, %v343_v47 }
 0x39a   :  { %2202 = vpow2.f32 %v1965_v48 }
 0x3a4   :  { %v2203_v49 = vpop.eup %2202 }
 0x3a5   :  { %v347_v50 = vadd.f32 1.0, %v2203_v49 }
 0x3a7   :  { %2204 = vrcp.f32 %v347_v50 }
 0x3b1   :  { %v2205_v51 = vpop.eup %2204 }
 0x3b2   :  { %v361_v63 = vsub.f32 1.0, %v2205_v51  ;;  %v367_v3 = vmul.f32 %v2205_v51, %v295_v38 }
 0x408   :  { %v352_v52 = vpop.permute.xlu0 %351 }
 0x409   :  { %v354_v53 = vmul.f32 %v2205_v51, %v352_v52 }
 0x40b   :  { %356 = vrot.lane.b32.xlu1 %v354_v53, %s2295_s27 }
 0x47d   :  { %v357_v54 = vpop.permute.xlu1 %356 }
 0x47e   :  { %v359_v55 = vadd.f32 %v357_v54, %v181_v46 }
 0x480   :  { %2206 = vtanh.f32 %v359_v55 }
 0x48a   :  { %v2207_v62 = vpop.eup %2206 }
 0x48b   :  { %363 = vrot.lane.b32.xlu0 %v2207_v62, %s2296_s5 }
 0x4fd   :  { %v364_v2 = vpop.permute.xlu0 %363 }
 0x4fe   :  { %v366_v5 = vmul.f32 %v364_v2, %v361_v63 }
 0x500   :  { %v368_v6 = vadd.f32 %v367_v3, %v366_v5 }
 0x502   :  { %v369_v7 = vpack.c.bf16 %v368_v6, %v368_v6 }
 0x504   :  { %371 = vrot.lane.b32.xlu1 %v369_v7, %s2296_s5  ;;  %v194_v7 = vadd.f32 %v2443_v22, %v2483_v9 }
 0x576   :  { %v372_v16 = vpop.permute.xlu1 %371 }
 0x577   :  { %2096 = vmatmul.mubr.msk.bf16.vlgmr.msra.gmra.mrb[8].mxu0 %vm226_vm3, %v372_v16 }
 0x578   :  { %2108 = vmatpush3.bf16.msra.mxu0 %v2385_v1  ;;  %2111 = vmatprep.mubr.msk.bf16.mxu0 %vm2293_vm1, %v2292_v0 }
 0x579   :  { %2109 = vmatprep.subr.bf16.mxu0 %v2292_v0 }
 0x57c   :  { %2110 = vmatpush3.bf16.msra.mxu0 %v2398_v4 }
 0x57d   :  { %2123 = vmatprep.subr.bf16.mxu0 %v2292_v0 }
 0x64a   :  { %v410_v17 = vpop.f32.mrb[8].mxu0 }
 0x64b   :  { %v411_v18 = vadd.f32 %v2434_v14, %v410_v17  ;;  %v2097_v19 = vpop.f32.mrb[9].mxu0 }
 0x64c   :  { %v413_v20 = vpop.f32.mrb[10].mxu0 }
 0x64d   :  { %424 = vrot.lane.b32.xlu0 %v411_v18, %s2295_s27  ;;  %v2098_v21 = vpop.f32.mrb[11].mxu0  ;;  %v416_v24 = vadd.f32 %v411_v18, %v186_v23 }
 0x64f   :  { %v1967_v25 = vmul.f32 -1.442695, %v416_v24 }
 0x651   :  { %2208 = vpow2.f32 %v1967_v25 }
 0x65b   :  { %v2209_v26 = vpop.eup %2208 }
 0x65c   :  { %v420_v27 = vadd.f32 1.0, %v2209_v26 }
 0x65e   :  { %2210 = vrcp.f32 %v420_v27 }
 0x668   :  { %v2211_v28 = vpop.eup %2210 }
 0x669   :  { %v434_v34 = vsub.f32 1.0, %v2211_v28  ;;  %v440_v12 = vmul.f32 %v2211_v28, %v368_v6 }
 0x6bf   :  { %v425_v29 = vpop.permute.xlu0 %424 }
 0x6c0   :  { %v427_v30 = vmul.f32 %v2211_v28, %v425_v29 }
 0x6c2   :  { %429 = vrot.lane.b32.xlu1 %v427_v30, %s2295_s27 }
 0x734   :  { %v430_v31 = vpop.permute.xlu1 %429 }
 0x735   :  { %v432_v32 = vadd.f32 %v430_v31, %v186_v23 }
 0x737   :  { %2212 = vtanh.f32 %v432_v32 }
 0x741   :  { %v2213_v33 = vpop.eup %2212 }
 0x742   :  { %436 = vrot.lane.b32.xlu0 %v2213_v33, %s2296_s5 }
 0x7b4   :  { %v437_v35 = vpop.permute.xlu0 %436 }
 0x7b5   :  { %v439_v36 = vmul.f32 %v437_v35, %v434_v34 }
 0x7b7   :  { %v441_v37 = vadd.f32 %v440_v12, %v439_v36 }
 0x7b9   :  { %v442_v38 = vpack.c.bf16 %v441_v37, %v441_v37 }
 0x7bb   :  { %444 = vrot.lane.b32.xlu1 %v442_v38, %s2296_s5 }
 0x82d   :  { %v445_v39 = vpop.permute.xlu1 %444 }
 0x82e   :  { %2104 = vmatmul.mubr.msk.bf16.vlgmr.msra.gmra.mrb[8].mxu1 %vm226_vm3, %v445_v39 }
 0x82f   :  { %2116 = vmatpush3.bf16.msra.mxu1 %v2385_v1  ;;  %2119 = vmatprep.mubr.msk.bf16.mxu1 %vm2293_vm1, %v2292_v0 }
 0x830   :  { %2117 = vmatprep.subr.bf16.mxu1 %v2292_v0 }
 0x833   :  { %2118 = vmatpush3.bf16.msra.mxu1 %v2398_v4 }
 0x834   :  { %2131 = vmatprep.subr.bf16.mxu1 %v2292_v0 }
 0x901   :  { %v483_v40 = vpop.f32.mrb[8].mxu1 }
 0x902   :  { %v484_v41 = vadd.f32 %v2434_v14, %v483_v40  ;;  %v2105_v42 = vpop.f32.mrb[9].mxu1 }
 0x903   :  { %v486_v43 = vpop.f32.mrb[10].mxu1 }
 0x904   :  { %497 = vrot.lane.b32.xlu0 %v484_v41, %s2295_s27  ;;  %v2106_v44 = vpop.f32.mrb[11].mxu1  ;;  %v489_v46 = vadd.f32 %v484_v41, %v189_v45 }
 0x906   :  { %v1969_v47 = vmul.f32 -1.442695, %v489_v46 }
 0x908   :  { %2214 = vpow2.f32 %v1969_v47 }
 0x912   :  { %v2215_v48 = vpop.eup %2214 }
 0x913   :  { %v493_v49 = vadd.f32 1.0, %v2215_v48 }
 0x915   :  { %2216 = vrcp.f32 %v493_v49 }
 0x91f   :  { %v2217_v50 = vpop.eup %2216 }
 0x920   :  { %v507_v56 = vsub.f32 1.0, %v2217_v50  ;;  %v513_v15 = vmul.f32 %v2217_v50, %v441_v37  ;;  %v197_v37 = vadd.f32 %v2443_v22, %v2487_v13 }
 0x976   :  { %v498_v51 = vpop.permute.xlu0 %497 }
 0x977   :  { %v500_v52 = vmul.f32 %v2217_v50, %v498_v51 }
 0x979   :  { %502 = vrot.lane.b32.xlu1 %v500_v52, %s2295_s27 }
 0x9eb   :  { %v503_v53 = vpop.permute.xlu1 %502 }
 0x9ec   :  { %v505_v54 = vadd.f32 %v503_v53, %v189_v45 }
 0x9ee   :  { %2218 = vtanh.f32 %v505_v54 }
 0x9f8   :  { %v2219_v55 = vpop.eup %2218 }
 0x9f9   :  { %509 = vrot.lane.b32.xlu0 %v2219_v55, %s2296_s5 }
 0xa6b   :  { %v510_v57 = vpop.permute.xlu0 %509 }
 0xa6c   :  { %v512_v58 = vmul.f32 %v510_v57, %v507_v56  ;;  %v202_v57 = vadd.f32 %v2481_v8, %v2443_v22 }
 0xa6e   :  { %v514_v59 = vadd.f32 %v513_v15, %v512_v58 }
 0xa70   :  { %v515_v61 = vpack.c.bf16 %v514_v59, %v514_v59 }
 0xa72   :  { %517 = vrot.lane.b32.xlu1 %v515_v61, %s2296_s5 }
 0xae4   :  { %v518_v62 = vpop.permute.xlu1 %517 }
 0xae5   :  { %2112 = vmatmul.mubr.msk.bf16.vlgmr.msra.gmra.mrb[12].mxu0 %vm226_vm3, %v518_v62 }
 0xae6   :  { %2124 = vmatpush3.bf16.msra.mxu0 %v2385_v1  ;;  %2127 = vmatprep.mubr.msk.bf16.mxu0 %vm2293_vm1, %v2292_v0 }
 0xae7   :  { %2125 = vmatprep.subr.bf16.mxu0 %v2292_v0 }
 0xaea   :  { %2126 = vmatpush3.bf16.msra.mxu0 %v2398_v4 }
 0xbb8   :  { %v556_v63 = vpop.f32.mrb[12].mxu0 }
 0xbb9   :  { %v557_v2 = vadd.f32 %v2434_v14, %v556_v63  ;;  %v2113_v3 = vpop.f32.mrb[13].mxu0 }
 0xbba   :  { %v559_v5 = vpop.f32.mrb[14].mxu0 }
 0xbbb   :  { %570 = vrot.lane.b32.xlu0 %v557_v2, %s2295_s27  ;;  %v2114_v6 = vpop.f32.mrb[15].mxu0  ;;  %v562_v16 = vadd.f32 %v557_v2, %v194_v7 }
 0xbbd   :  { %v1971_v17 = vmul.f32 -1.442695, %v562_v16 }
 0xbbf   :  { %2220 = vpow2.f32 %v1971_v17 }
 0xbc9   :  { %v2221_v18 = vpop.eup %2220 }
 0xbca   :  { %v566_v19 = vadd.f32 1.0, %v2221_v18 }
 0xbcc   :  { %2222 = vrcp.f32 %v566_v19 }
 0xbd6   :  { %v2223_v20 = vpop.eup %2222 }
 0xbd7   :  { %v580_v27 = vsub.f32 1.0, %v2223_v20  ;;  %v586_v9 = vmul.f32 %v2223_v20, %v514_v59 }
 0xc2d   :  { %v571_v21 = vpop.permute.xlu0 %570 }
 0xc2e   :  { %v573_v23 = vmul.f32 %v2223_v20, %v571_v21 }
 0xc30   :  { %575 = vrot.lane.b32.xlu1 %v573_v23, %s2295_s27 }
 0xca2   :  { %v576_v24 = vpop.permute.xlu1 %575 }
 0xca3   :  { %v578_v25 = vadd.f32 %v576_v24, %v194_v7 }
 0xca5   :  { %2224 = vtanh.f32 %v578_v25 }
 0xcaf   :  { %v2225_v26 = vpop.eup %2224 }
 0xcb0   :  { %582 = vrot.lane.b32.xlu0 %v2225_v26, %s2296_s5 }
 0xd22   :  { %v583_v28 = vpop.permute.xlu0 %582 }
 0xd23   :  { %v585_v29 = vmul.f32 %v583_v28, %v580_v27  ;;  %v205_v27 = vadd.f32 %v2485_v10, %v2443_v22  ;;  %v2297_v22 = vmov 1966171168  }
 0xd24   :  { %v841_v10 = vunpack.c.l.s4 %v2297_v22 }
 0xd25   :  { %v587_v30 = vadd.f32 %v586_v9, %v585_v29 }
 0xd27   :  { %v588_v31 = vpack.c.bf16 %v587_v30, %v587_v30 }
 0xd29   :  { %590 = vrot.lane.b32.xlu1 %v588_v31, %s2296_s5 }
 0xd9b   :  { %v591_v32 = vpop.permute.xlu1 %590 }
 0xd9c   :  { %2120 = vmatmul.mubr.msk.bf16.vlgmr.msra.gmra.mrb[12].mxu1 %vm226_vm3, %v591_v32 }
 0xd9d   :  { %2132 = vmatpush3.bf16.msra.mxu1 %v2385_v1  ;;  %2135 = vmatprep.mubr.msk.bf16.mxu1 %vm2293_vm1, %v2292_v0 }
 0xd9e   :  { %2133 = vmatprep.subr.bf16.mxu1 %v2292_v0 }
 0xda1   :  { %2134 = vmatpush3.bf16.msra.mxu1 %v2398_v4 }
 0xe6f   :  { %v629_v33 = vpop.f32.mrb[12].mxu1 }
 0xe70   :  { %v630_v34 = vadd.f32 %v2434_v14, %v629_v33  ;;  %v2121_v35 = vpop.f32.mrb[13].mxu1 }
 0xe71   :  { %v632_v12 = vpop.f32.mrb[14].mxu1  ;;  %v821_v35 = vlaneseq }
 0xe72   :  { %643 = vrot.lane.b32.xlu0 %v630_v34, %s2295_s27  ;;  %v2122_v36 = vpop.f32.mrb[15].mxu1  ;;  %v635_v38 = vadd.f32 %v630_v34, %v197_v37  ;;  %v2566_v12 = vld [vmem:[%s2942_s7 + $0x4] ss:$8 sps:$4 sm:$0xff]  }
 0xe73   :  { %v2571_v36 = vld [vmem:[%s2942_s7] ss:$8 sps:$4 sm:$0xff]   ;;  %960 = vmatprep.subr.bf16.mxu1 %v2566_v12 }
 0xe74   :  { %v1973_v1 = vmul.f32 -1.442695, %v635_v38  ;;  %v2579_v38 = vld [vmem:[%s2942_s7 + $0x14] ss:$8 sps:$4 sm:$0xff]  }
 0xe76   :  { %2226 = vpow2.f32 %v1973_v1  ;;  %v2584_v1 = vld [vmem:[%s2942_s7 + $0x10] ss:$8 sps:$4 sm:$0xff]  }
 0xe80   :  { %v2227_v39 = vpop.eup %2226 }
 0xe81   :  { %v639_v40 = vadd.f32 1.0, %v2227_v39  ;;  %v842_v39 = vunpack.c.0.s8 %v841_v10  ;;  %v2697_v10 = vld [vmem:[%s2947_s10 + $0x20] ss:$8 sps:$4 sm:$0xff]  }
 0xe83   :  { %2228 = vrcp.f32 %v639_v40  ;;  %v1979_v40 = vld.sshfl [vmem:[%s2943_s6] sm:$0x11 pattern:$0x75316420] }
 0xe8d   :  { %v2229_v41 = vpop.eup %2228 }
 0xe8e   :  { %v653_v46 = vsub.f32 1.0, %v2229_v41  ;;  %v659_v13 = vmul.f32 %v2229_v41, %v587_v30 }
 0xee4   :  { %v644_v42 = vpop.permute.xlu0 %643 }
 0xee5   :  { %v646_v4 = vmul.f32 %v2229_v41, %v644_v42  ;;  %v839_v41 = vcombine.high %v1979_v40, %v1979_v40 }
 0xee7   :  { %648 = vrot.lane.b32.xlu1 %v646_v4, %s2295_s27  ;;  %v2595_v4 = vld [vmem:[%s2942_s7 + $0x24] ss:$8 sps:$4 sm:$0xff]  }
 0xf59   :  { %v649_v43 = vpop.permute.xlu1 %648 }
 0xf5a   :  { %v651_v44 = vadd.f32 %v649_v43, %v197_v37  ;;  %v2573_v37 = vshrl.u32 %v821_v35, 7  ;;  %v2690_v35 = vld [vmem:[%s2947_s10 + $0x24] ss:$8 sps:$4 sm:$0xff]  }
 0xf5c   :  { %2230 = vtanh.f32 %v651_v44  ;;  %v845_v42 = vsub.s32 %v842_v39, %v2573_v37  ;;  %v2709_v39 = vld [vmem:[%s2947_s10 + $0x30] ss:$8 sps:$4 sm:$0xff]  }
 0xf5e   :  { %v853_v43 = vrot.slane %v839_v41, %v845_v42  ;;  %v846_v44 = vrot.slane %v1979_v40, %v845_v42 }
 0xf60   :  { %1980 = vmatprep.subr.msk.bf16.mxu0 %vm139_vm0, %v853_v43 }
 0xf66   :  { %v2231_v45 = vpop.eup %2230 }
 0xf67   :  { %655 = vrot.lane.b32.xlu0 %v2231_v45, %s2296_s5 }
 0xfd9   :  { %v656_v47 = vpop.permute.xlu0 %655 }
 0xfda   :  { %v658_v48 = vmul.f32 %v656_v47, %v653_v46  ;;  %v2601_v46 = vld [vmem:[%s2942_s7 + $0x20] ss:$8 sps:$4 sm:$0xff]   ;;  %v858_v47 = vsel %vm139_vm0, %v846_v44, 0 }
 0xfdc   :  { %v660_v49 = vadd.f32 %v659_v13, %v658_v48  ;;  %v2609_v13 = vld [vmem:[%s2942_s7 + $0x34] ss:$8 sps:$4 sm:$0xff]   ;;  %v807_v48 = vld [vmem:[%s2944_s1] sm:$0xff]  ;;  %s2300_s1 = smov 72  }
 0xfde   :  { %v661_v50 = vpack.c.bf16 %v660_v49, %v660_v49 }
 0xfe0   :  { %663 = vrot.lane.b32.xlu1 %v661_v50, %s2296_s5  ;;  %v2622_v50 = vld [vmem:[%s2942_s7 + $0x30] ss:$8 sps:$4 sm:$0xff]  }
0x1052   :  { %v664_v51 = vpop.permute.xlu1 %663 }
0x1053   :  { %2128 = vmatmul.mubr.msk.bf16.vlgmr.msra.gmra.mrb[16].mxu0 %vm226_vm3, %v664_v51 }
0x1054   :  { %895 = vmatprep.mubr.bf16.mxu0 %v2294_v11  ;;  %864 = vmatpush1.bf16.msra.mxu0 %v858_v47 }
0x1126   :  { %v702_v52 = vpop.f32.mrb[16].mxu0 }
0x1127   :  { %v703_v53 = vadd.f32 %v2434_v14, %v702_v52  ;;  %v2129_v54 = vpop.f32.mrb[17].mxu0 }
0x1128   :  { %v705_v55 = vpop.f32.mrb[18].mxu0 }
0x1129   :  { %716 = vrot.lane.b32.xlu0 %v703_v53, %s2295_s27  ;;  %v2130_v56 = vpop.f32.mrb[19].mxu0  ;;  %v708_v15 = vadd.f32 %v703_v53, %v202_v57 }
0x112b   :  { %v1975_v58 = vmul.f32 -1.442695, %v708_v15 }
0x112d   :  { %2232 = vpow2.f32 %v1975_v58 }
0x1137   :  { %v2233_v59 = vpop.eup %2232 }
0x1138   :  { %v712_v61 = vadd.f32 1.0, %v2233_v59 }
0x113a   :  { %2234 = vrcp.f32 %v712_v61 }
0x1144   :  { %v2235_v62 = vpop.eup %2234 }
0x1145   :  { %v726_v7 = vsub.f32 1.0, %v2235_v62  ;;  %v732_v8 = vmul.f32 %v2235_v62, %v660_v49  ;;  %v819_v49 = vpack.c.bf16 %v2472_v60, %v2472_v60 }
0x1147   :  { %1981 = vmatmul.mubr.msk.bf16.vlgmr.msra.gmra.mrb[20].mxu0 %vm126_vm2, %v819_v49  ;;  %v74_v49 = vld [vmem:[%s2948_s11] sm:$0x3] }
0x1148   :  { %1113 = vmatprep.mubr.bf16.mxu0 %v2294_v11 }
0x119b   :  { %v717_v63 = vpop.permute.xlu0 %716 }
0x119c   :  { %v719_v2 = vmul.f32 %v2235_v62, %v717_v63  ;;  %v2643_v63 = vsub.s32 0, %v2573_v37 }
0x119e   :  { %721 = vrot.lane.b32.xlu1 %v719_v2, %s2295_s27  ;;  %v64_v2 = vld [vmem:[%s2945_s8] sm:$0x3] }
0x1210   :  { %v722_v3 = vpop.permute.xlu1 %721 }
0x1211   :  { %v724_v5 = vadd.f32 %v722_v3, %v202_v57  ;;  %v65_v3 = vld [vmem:[%s2946_s9] sm:$0x3] }
0x1213   :  { %2236 = vtanh.f32 %v724_v5  ;;  %v824_v5 = vrot.slane %v64_v2, %v2643_v63 }
0x121a   :  { %v897_v58 = vpop.f32.mrb[20].mxu0 }
0x121b   :  { %v899_v59 = vpop.f32.mrb[21].mxu0 }
0x121c   :  { %v901_v61 = vpop.f32.mrb[22].mxu0 }
0x121d   :  { %v2237_v6 = vpop.eup %2236  ;;  %v902_v62 = vpop.f32.mrb[23].mxu0 }
0x121e   :  { %728 = vrot.lane.b32.xlu0 %v2237_v6, %s2296_s5  ;;  %v2653_v6 = vrot.slane %v65_v3, %v2643_v63 }
0x1290   :  { %v729_v16 = vpop.permute.xlu0 %728 }
0x1291   :  { %v731_v17 = vmul.f32 %v729_v16, %v726_v7  ;;  %v898_v7 = vadd.f32 %v897_v58, %v824_v5 }
0x1293   :  { %v2551_v18 = vadd.f32 %v732_v8, %v731_v17 }
0x1295   :  { %v734_v19 = vpack.c.bf16 %v2551_v18, %v2551_v18 }
0x1297   :  { %736 = vrot.lane.b32.xlu1 %v734_v19, %s2296_s5 }
0x1309   :  { %v737_v20 = vpop.permute.xlu1 %736 }
0x130a   :  { %2136 = vmatmul.mubr.msk.bf16.vlgmr.msra.gmra.mrb[16].mxu1 %vm226_vm3, %v737_v20 }
0x130b   :  { %992 = vmatprep.mubr.bf16.mxu1 %v2294_v11  ;;  %961 = vmatpush1.bf16.msra.mxu1 %v2571_v36 }
0x130c   :  { %962 = vmatprep.subr.bf16.mxu1 %v2579_v38 }
0x130f   :  { %963 = vmatpush1.bf16.msra.mxu1 %v2584_v1 }
0x1310   :  { %964 = vmatprep.subr.bf16.mxu1 %v2595_v4 }
0x1313   :  { %965 = vmatpush1.bf16.msra.mxu1 %v2601_v46 }
0x1314   :  { %966 = vmatprep.subr.bf16.mxu1 %v2609_v13 }
0x1317   :  { %967 = vmatpush1.bf16.msra.mxu1 %v2622_v50 }
0x1318   :  { %1122 = vmatprep.subr.bf16.mxu1 %v2566_v12 }
0x13dd   :  { %v775_v21 = vpop.f32.mrb[16].mxu1 }
0x13de   :  { %v776_v23 = vadd.f32 %v2434_v14, %v775_v21  ;;  %v2137_v24 = vpop.f32.mrb[17].mxu1 }
0x13df   :  { %v778_v25 = vpop.f32.mrb[18].mxu1 }
0x13e0   :  { %789 = vrot.lane.b32.xlu0 %v776_v23, %s2295_s27  ;;  %v2138_v26 = vpop.f32.mrb[19].mxu1  ;;  %v781_v28 = vadd.f32 %v776_v23, %v205_v27  ;;  %v2657_v25 = vsub.s32 1, %v2573_v37  ;;  %v2703_v37 = vld [vmem:[%s2947_s10 + $0x34] ss:$8 sps:$4 sm:$0xff]  }
0x13e2   :  { %v1977_v9 = vmul.f32 -1.442695, %v781_v28  ;;  %v2660_v26 = vrot.slane %v65_v3, %v2657_v25 }
0x13e4   :  { %2238 = vpow2.f32 %v1977_v9 }
0x13ee   :  { %v2239_v29 = vpop.eup %2238 }
0x13ef   :  { %v785_v30 = vadd.f32 1.0, %v2239_v29 }
0x13f1   :  { %2240 = vrcp.f32 %v785_v30 }
0x13fb   :  { %v2241_v31 = vpop.eup %2240 }
0x13fc   :  { %v799_v51 = vsub.f32 1.0, %v2241_v31  ;;  %v805_v53 = vmul.f32 %v2241_v31, %v2551_v18 }
0x1452   :  { %v790_v32 = vpop.permute.xlu0 %789 }
0x1453   :  { %v792_v33 = vmul.f32 %v2241_v31, %v790_v32  ;;  %v2667_v32 = vld [vmem:[%s2947_s10 + $0x4] ss:$8 sps:$4 sm:$0xff]  }
0x1454   :  { %1081 = vmatprep.subr.bf16.mxu0 %v2667_v32 }
0x1455   :  { %794 = vrot.lane.b32.xlu1 %v792_v33, %s2295_s27  ;;  %v2672_v33 = vld [vmem:[%s2947_s10] ss:$8 sps:$4 sm:$0xff]  }
0x1456   :  { %1082 = vmatpush1.bf16.msra.mxu0 %v2672_v33 }
0x14c7   :  { %v795_v14 = vpop.permute.xlu1 %794 }
0x14c8   :  { %v797_v34 = vadd.f32 %v795_v14, %v205_v27  ;;  %v828_v27 = vrot.slane %v64_v2, %v2657_v25  ;;  %v2678_v14 = vld [vmem:[%s2947_s10 + $0x14] ss:$8 sps:$4 sm:$0xff]  }
0x14c9   :  { %1083 = vmatprep.subr.bf16.mxu0 %v2678_v14 }
0x14ca   :  { %2242 = vtanh.f32 %v797_v34  ;;  %v900_v29 = vadd.f32 %v899_v59, %v828_v27  ;;  %v2684_v34 = vld [vmem:[%s2947_s10 + $0x10] ss:$8 sps:$4 sm:$0xff]  }
0x14cb   :  { %1084 = vmatpush1.bf16.msra.mxu0 %v2684_v34 }
0x14cc   :  { %1085 = vmatprep.subr.bf16.mxu0 %v2690_v35 }
0x14cf   :  { %1086 = vmatpush1.bf16.msra.mxu0 %v2697_v10 }
0x14d0   :  { %1087 = vmatprep.subr.bf16.mxu0 %v2703_v37 }
0x14d3   :  { %1088 = vmatpush1.bf16.msra.mxu0 %v2709_v39 }
0x14d4   :  { %v2243_v45 = vpop.eup %2242  ;;  %1188 = vmatprep.subr.bf16.mxu0 %v2667_v32 }
0x14d5   :  { %801 = vrot.lane.b32.xlu0 %v2243_v45, %s2296_s5 }
0x14d9   :  { %813 = vrot.lane.b32.xlu0 %v807_v48, %s2298_s19  ;;  %s2299_s19 = smov 68  }
0x1547   :  { %v802_v52 = vpop.permute.xlu0 %801 }
0x1548   :  { %v804_v54 = vmul.f32 %v802_v52, %v799_v51  ;;  %v2739_v51 = vrot.slane %v74_v49, %v2643_v63  ;;  %v2744_v63 = vrot.slane %v74_v49, %v2657_v25 }
0x154a   :  { %v806_v55 = vadd.f32 %v805_v53, %v804_v54 }
0x154b   :  { %v814_v60 = vpop.permute.xlu0 %813 }
0x154c   :  { %809 = vrot.lane.b32.xlu1 %v806_v55, %s2296_s5 }
0x15be   :  { %v810_v56 = vpop.permute.xlu1 %809 }
0x15bf   :  { %v816_v57 = vsel %vm226_vm3, %v810_v56, %v814_v60 }
0x15c0   :  { %1018 = vrot.lane.b32.xlu0 %v816_v57, %s2295_s27  ;;  %v904_v15 = vpack.c.bf16 %v816_v57, %v816_v57 }
0x15c2   :  { %1990 = vmatmul.mubr.msk.bf16.vlgmr.msra.gmra.mrb[20].mxu1 %vm956_vm4, %v904_v15 }
0x15c3   :  { %1123 = vmatpush1.bf16.msra.mxu1 %v2571_v36  ;;  %1154 = vmatprep.mubr.bf16.mxu1 %v2294_v11 }
0x15c4   :  { %1124 = vmatprep.subr.bf16.mxu1 %v2579_v38 }
0x15c7   :  { %1125 = vmatpush1.bf16.msra.mxu1 %v2584_v1 }
0x15c8   :  { %1126 = vmatprep.subr.bf16.mxu1 %v2595_v4 }
0x15cb   :  { %1127 = vmatpush1.bf16.msra.mxu1 %v2601_v46 }
0x15cc   :  { %1128 = vmatprep.subr.bf16.mxu1 %v2609_v13 }
0x15cf   :  { %1129 = vmatpush1.bf16.msra.mxu1 %v2622_v50 }
0x15d0   :  { %1229 = vmatprep.subr.bf16.mxu1 %v2566_v12 }
0x1632   :  { %v1019_v41 = vpop.permute.xlu0 %1018 }
0x1695   :  { %v994_v16 = vpop.f32.mrb[20].mxu1 }
0x1696   :  { %v995_v8 = vadd.f32 %v994_v16, %v2653_v6  ;;  %v996_v17 = vpop.f32.mrb[21].mxu1 }
0x1697   :  { %v998_v18 = vpop.f32.mrb[22].mxu1  ;;  %v997_v28 = vadd.f32 %v996_v17, %v2660_v26 }
0x1698   :  { %v1001_v19 = vadd.f32 %v995_v8, %v898_v7  ;;  %v999_v20 = vpop.f32.mrb[23].mxu1 }
0x169a   :  { %v1991_v21 = vmul.f32 -1.442695, %v1001_v19 }
0x169c   :  { %2244 = vpow2.f32 %v1991_v21 }
0x16a6   :  { %v2245_v23 = vpop.eup %2244 }
0x16a7   :  { %v1005_v24 = vadd.f32 1.0, %v2245_v23 }
0x16a9   :  { %2246 = vrcp.f32 %v1005_v24 }
0x16b3   :  { %v2247_v9 = vpop.eup %2246 }
0x16b4   :  { %v1008_v30 = vmul.f32 %v2247_v9, %v997_v28  ;;  %v1011_v40 = vsub.f32 1.0, %v2247_v9  ;;  %v1021_v43 = vmul.f32 %v2247_v9, %v1019_v41 }
0x16b6   :  { %v1009_v31 = vadd.f32 %v1008_v30, %v900_v29 }
0x16b8   :  { %2248 = vtanh.f32 %v1009_v31 }
0x16c2   :  { %v2249_v22 = vpop.eup %2248 }
0x16c3   :  { %1013 = vrot.lane.b32.xlu1 %v2249_v22, %s2295_s27 }
0x1735   :  { %v1014_v42 = vpop.permute.xlu1 %1013 }
0x1736   :  { %v1016_v44 = vmul.f32 %v1014_v42, %v1011_v40 }
0x1738   :  { %v1022_v45 = vadd.f32 %v1021_v43, %v1016_v44 }
0x173a   :  { %v1023_v47 = vpack.c.bf16 %v1022_v45, %v1022_v45 }
0x173c   :  { %1036 = vrot.lane.b32.xlu1 %v1023_v47, %s2295_s27 }
0x17ae   :  { %v1037_v48 = vpop.permute.xlu1 %1036 }
0x17af   :  { %2000 = vmatmul.mubr.msk.bf16.vlgmr.msra.gmra.mrb[24].mxu0 %vm956_vm4, %v1037_v48  ;;  %2001 = vmatmul.mubr.msk.bf16.vlgmr.msra.gmra.mrb[24].mxu1 %vm956_vm4, %v1037_v48 }
0x17b0   :  { %1189 = vmatpush1.bf16.msra.mxu0 %v2672_v33  ;;  %1230 = vmatpush1.bf16.msra.mxu1 %v2571_v36 }
0x17b1   :  { %1190 = vmatprep.subr.bf16.mxu0 %v2678_v14  ;;  %1231 = vmatprep.subr.bf16.mxu1 %v2579_v38 }
0x17b2   :  { %1220 = vmatprep.mubr.bf16.mxu0 %v2294_v11  ;;  %1261 = vmatprep.mubr.bf16.mxu1 %v2294_v11 }
0x17b4   :  { %1191 = vmatpush1.bf16.msra.mxu0 %v2684_v34  ;;  %1232 = vmatpush1.bf16.msra.mxu1 %v2584_v1 }
0x17b5   :  { %1192 = vmatprep.subr.bf16.mxu0 %v2690_v35  ;;  %1233 = vmatprep.subr.bf16.mxu1 %v2595_v4 }
0x17b8   :  { %1193 = vmatpush1.bf16.msra.mxu0 %v2697_v10  ;;  %1234 = vmatpush1.bf16.msra.mxu1 %v2601_v46 }
0x17b9   :  { %1194 = vmatprep.subr.bf16.mxu0 %v2703_v37  ;;  %1235 = vmatprep.subr.bf16.mxu1 %v2609_v13 }
0x17bc   :  { %1195 = vmatpush1.bf16.msra.mxu0 %v2709_v39  ;;  %1236 = vmatpush1.bf16.msra.mxu1 %v2622_v50 }
0x17bd   :  { %1295 = vmatprep.subr.bf16.mxu0 %v2667_v32  ;;  %1336 = vmatprep.subr.bf16.mxu1 %v2566_v12 }
0x1882   :  { %v1115_v52 = vpop.f32.mrb[24].mxu0  ;;  %v1156_v53 = vpop.f32.mrb[24].mxu1 }
0x1883   :  { %v1116_v54 = vadd.f32 %v1115_v52, %v2739_v51  ;;  %v1157_v55 = vadd.f32 %v1156_v53, %v2653_v6  ;;  %v1117_v60 = vpop.f32.mrb[25].mxu0  ;;  %v1158_v56 = vpop.f32.mrb[25].mxu1 }
0x1884   :  { %v1119_v57 = vpop.f32.mrb[26].mxu0  ;;  %v1160_v15 = vpop.f32.mrb[26].mxu1  ;;  %v1159_v5 = vadd.f32 %v1158_v56, %v2660_v26  ;;  %v2748_v16 = vadd.f32 %v1117_v60, %v2744_v63 }
0x1885   :  { %v1163_v58 = vadd.f32 %v1157_v55, %v1116_v54  ;;  %v1120_v59 = vpop.f32.mrb[27].mxu0  ;;  %v1161_v61 = vpop.f32.mrb[27].mxu1 }
0x1887   :  { %v2002_v62 = vmul.f32 -1.442695, %v1163_v58 }
0x1889   :  { %2250 = vpow2.f32 %v2002_v62 }
0x1893   :  { %v2251_v2 = vpop.eup %2250 }
0x1894   :  { %v1167_v3 = vadd.f32 1.0, %v2251_v2 }
0x1896   :  { %2252 = vrcp.f32 %v1167_v3 }
0x18a0   :  { %v2253_v7 = vpop.eup %2252 }
0x18a1   :  { %v1170_v8 = vmul.f32 %v2253_v7, %v1159_v5  ;;  %v1173_v19 = vsub.f32 1.0, %v2253_v7  ;;  %v1179_v21 = vmul.f32 %v2253_v7, %v1022_v45 }
0x18a3   :  { %v1171_v17 = vadd.f32 %v1170_v8, %v2748_v16 }
0x18a5   :  { %2254 = vtanh.f32 %v1171_v17 }
0x18af   :  { %v2255_v18 = vpop.eup %2254 }
0x18b0   :  { %1175 = vrot.lane.b32.xlu0 %v2255_v18, %s2295_s27 }
0x1922   :  { %v1176_v20 = vpop.permute.xlu0 %1175 }
0x1923   :  { %v1178_v23 = vmul.f32 %v1176_v20, %v1173_v19 }
0x1925   :  { %v1180_v24 = vadd.f32 %v1179_v21, %v1178_v23 }
0x1927   :  { %v1181_v25 = vpack.c.bf16 %v1180_v24, %v1180_v24 }
0x1929   :  { %1183 = vrot.lane.b32.xlu1 %v1181_v25, %s2295_s27 }
0x199b   :  { %v1184_v27 = vpop.permute.xlu1 %1183 }
0x199c   :  { %2003 = vmatmul.mubr.msk.bf16.vlgmr.msra.gmra.mrb[28].mxu0 %vm956_vm4, %v1184_v27  ;;  %2004 = vmatmul.mubr.msk.bf16.vlgmr.msra.gmra.mrb[28].mxu1 %vm956_vm4, %v1184_v27 }
0x199d   :  { %1296 = vmatpush1.bf16.msra.mxu0 %v2672_v33  ;;  %1337 = vmatpush1.bf16.msra.mxu1 %v2571_v36 }
0x199e   :  { %1297 = vmatprep.subr.bf16.mxu0 %v2678_v14  ;;  %1338 = vmatprep.subr.bf16.mxu1 %v2579_v38 }
0x199f   :  { %1327 = vmatprep.mubr.bf16.mxu0 %v2294_v11  ;;  %1368 = vmatprep.mubr.bf16.mxu1 %v2294_v11 }
0x19a1   :  { %1298 = vmatpush1.bf16.msra.mxu0 %v2684_v34  ;;  %1339 = vmatpush1.bf16.msra.mxu1 %v2584_v1 }
0x19a2   :  { %1299 = vmatprep.subr.bf16.mxu0 %v2690_v35  ;;  %1340 = vmatprep.subr.bf16.mxu1 %v2595_v4 }
0x19a5   :  { %1300 = vmatpush1.bf16.msra.mxu0 %v2697_v10  ;;  %1341 = vmatpush1.bf16.msra.mxu1 %v2601_v46 }
0x19a6   :  { %1301 = vmatprep.subr.bf16.mxu0 %v2703_v37  ;;  %1342 = vmatprep.subr.bf16.mxu1 %v2609_v13 }
0x19a9   :  { %1302 = vmatpush1.bf16.msra.mxu0 %v2709_v39  ;;  %1343 = vmatpush1.bf16.msra.mxu1 %v2622_v50 }
0x19aa   :  { %1402 = vmatprep.subr.bf16.mxu0 %v2667_v32  ;;  %1443 = vmatprep.subr.bf16.mxu1 %v2566_v12 }
0x1a6f   :  { %v1222_v28 = vpop.f32.mrb[28].mxu0  ;;  %v1263_v9 = vpop.f32.mrb[28].mxu1 }
0x1a70   :  { %v1223_v29 = vadd.f32 %v1222_v28, %v2739_v51  ;;  %v1264_v30 = vadd.f32 %v1263_v9, %v2653_v6  ;;  %v1224_v31 = vpop.f32.mrb[29].mxu0  ;;  %v1265_v22 = vpop.f32.mrb[29].mxu1 }
0x1a71   :  { %v1226_v40 = vpop.f32.mrb[30].mxu0  ;;  %v1267_v41 = vpop.f32.mrb[30].mxu1  ;;  %v1266_v49 = vadd.f32 %v1265_v22, %v2660_v26  ;;  %v2777_v53 = vadd.f32 %v1224_v31, %v2744_v63 }
0x1a72   :  { %v1270_v42 = vadd.f32 %v1264_v30, %v1223_v29  ;;  %v1227_v43 = vpop.f32.mrb[31].mxu0  ;;  %v1268_v44 = vpop.f32.mrb[31].mxu1 }
0x1a74   :  { %v2005_v45 = vmul.f32 -1.442695, %v1270_v42 }
0x1a76   :  { %2256 = vpow2.f32 %v2005_v45 }
0x1a80   :  { %v2257_v47 = vpop.eup %2256 }
0x1a81   :  { %v1274_v48 = vadd.f32 1.0, %v2257_v47 }
0x1a83   :  { %2258 = vrcp.f32 %v1274_v48 }
0x1a8d   :  { %v2259_v52 = vpop.eup %2258 }
0x1a8e   :  { %v1277_v54 = vmul.f32 %v2259_v52, %v1266_v49  ;;  %v1280_v56 = vsub.f32 1.0, %v2259_v52  ;;  %v1286_v15 = vmul.f32 %v2259_v52, %v1180_v24 }
0x1a90   :  { %v1278_v55 = vadd.f32 %v1277_v54, %v2777_v53 }
0x1a92   :  { %2260 = vtanh.f32 %v1278_v55 }
0x1a9c   :  { %v2261_v60 = vpop.eup %2260 }
0x1a9d   :  { %1282 = vrot.lane.b32.xlu0 %v2261_v60, %s2295_s27 }
0x1b0f   :  { %v1283_v57 = vpop.permute.xlu0 %1282 }
0x1b10   :  { %v1285_v58 = vmul.f32 %v1283_v57, %v1280_v56 }
0x1b12   :  { %v1287_v59 = vadd.f32 %v1286_v15, %v1285_v58 }
0x1b14   :  { %v1288_v61 = vpack.c.bf16 %v1287_v59, %v1287_v59 }
0x1b16   :  { %1290 = vrot.lane.b32.xlu1 %v1288_v61, %s2295_s27 }
0x1b88   :  { %v1291_v62 = vpop.permute.xlu1 %1290 }
0x1b89   :  { %2006 = vmatmul.mubr.msk.bf16.vlgmr.msra.gmra.mrb[32].mxu0 %vm956_vm4, %v1291_v62  ;;  %2007 = vmatmul.mubr.msk.bf16.vlgmr.msra.gmra.mrb[32].mxu1 %vm956_vm4, %v1291_v62 }
0x1b8a   :  { %1403 = vmatpush1.bf16.msra.mxu0 %v2672_v33  ;;  %1444 = vmatpush1.bf16.msra.mxu1 %v2571_v36 }
0x1b8b   :  { %1404 = vmatprep.subr.bf16.mxu0 %v2678_v14  ;;  %1445 = vmatprep.subr.bf16.mxu1 %v2579_v38 }
0x1b8c   :  { %1434 = vmatprep.mubr.bf16.mxu0 %v2294_v11  ;;  %1475 = vmatprep.mubr.bf16.mxu1 %v2294_v11 }
0x1b8e   :  { %1405 = vmatpush1.bf16.msra.mxu0 %v2684_v34  ;;  %1446 = vmatpush1.bf16.msra.mxu1 %v2584_v1 }
0x1b8f   :  { %1406 = vmatprep.subr.bf16.mxu0 %v2690_v35  ;;  %1447 = vmatprep.subr.bf16.mxu1 %v2595_v4 }
0x1b92   :  { %1407 = vmatpush1.bf16.msra.mxu0 %v2697_v10  ;;  %1448 = vmatpush1.bf16.msra.mxu1 %v2601_v46 }
0x1b93   :  { %1408 = vmatprep.subr.bf16.mxu0 %v2703_v37  ;;  %1449 = vmatprep.subr.bf16.mxu1 %v2609_v13 }
0x1b96   :  { %1409 = vmatpush1.bf16.msra.mxu0 %v2709_v39  ;;  %1450 = vmatpush1.bf16.msra.mxu1 %v2622_v50 }
0x1b97   :  { %1509 = vmatprep.subr.bf16.mxu0 %v2667_v32  ;;  %1550 = vmatprep.subr.bf16.mxu1 %v2566_v12 }
0x1c5c   :  { %v1329_v2 = vpop.f32.mrb[32].mxu0  ;;  %v1370_v3 = vpop.f32.mrb[32].mxu1 }
0x1c5d   :  { %v1330_v5 = vadd.f32 %v1329_v2, %v2739_v51  ;;  %v1371_v7 = vadd.f32 %v1370_v3, %v2653_v6  ;;  %v1331_v8 = vpop.f32.mrb[33].mxu0  ;;  %v1372_v17 = vpop.f32.mrb[33].mxu1 }
0x1c5e   :  { %v1333_v18 = vpop.f32.mrb[34].mxu0  ;;  %v1374_v19 = vpop.f32.mrb[34].mxu1  ;;  %v1373_v28 = vadd.f32 %v1372_v17, %v2660_v26  ;;  %v2806_v29 = vadd.f32 %v1331_v8, %v2744_v63 }
0x1c5f   :  { %v1377_v20 = vadd.f32 %v1371_v7, %v1330_v5  ;;  %v1334_v21 = vpop.f32.mrb[35].mxu0  ;;  %v1375_v23 = vpop.f32.mrb[35].mxu1 }
0x1c61   :  { %v2008_v24 = vmul.f32 -1.442695, %v1377_v20 }
0x1c63   :  { %2262 = vpow2.f32 %v2008_v24 }
0x1c6d   :  { %v2263_v25 = vpop.eup %2262 }
0x1c6e   :  { %v1381_v27 = vadd.f32 1.0, %v2263_v25 }
0x1c70   :  { %2264 = vrcp.f32 %v1381_v27 }
0x1c7a   :  { %v2265_v9 = vpop.eup %2264 }
0x1c7b   :  { %v1384_v30 = vmul.f32 %v2265_v9, %v1373_v28  ;;  %v1387_v40 = vsub.f32 1.0, %v2265_v9  ;;  %v1393_v42 = vmul.f32 %v2265_v9, %v1287_v59 }
0x1c7d   :  { %v1385_v31 = vadd.f32 %v1384_v30, %v2806_v29 }
0x1c7f   :  { %2266 = vtanh.f32 %v1385_v31 }
0x1c89   :  { %v2267_v22 = vpop.eup %2266 }
0x1c8a   :  { %1389 = vrot.lane.b32.xlu0 %v2267_v22, %s2295_s27 }
0x1cfc   :  { %v1390_v41 = vpop.permute.xlu0 %1389 }
0x1cfd   :  { %v1392_v43 = vmul.f32 %v1390_v41, %v1387_v40 }
0x1cff   :  { %v1394_v44 = vadd.f32 %v1393_v42, %v1392_v43 }
0x1d01   :  { %v1395_v45 = vpack.c.bf16 %v1394_v44, %v1394_v44 }
0x1d03   :  { %1397 = vrot.lane.b32.xlu1 %v1395_v45, %s2295_s27 }
0x1d75   :  { %v1398_v47 = vpop.permute.xlu1 %1397 }
0x1d76   :  { %2009 = vmatmul.mubr.msk.bf16.vlgmr.msra.gmra.mrb[36].mxu0 %vm956_vm4, %v1398_v47  ;;  %2010 = vmatmul.mubr.msk.bf16.vlgmr.msra.gmra.mrb[36].mxu1 %vm956_vm4, %v1398_v47 }
0x1d77   :  { %1510 = vmatpush1.bf16.msra.mxu0 %v2672_v33  ;;  %1551 = vmatpush1.bf16.msra.mxu1 %v2571_v36 }
0x1d78   :  { %1511 = vmatprep.subr.bf16.mxu0 %v2678_v14  ;;  %1552 = vmatprep.subr.bf16.mxu1 %v2579_v38 }
0x1d79   :  { %1541 = vmatprep.mubr.bf16.mxu0 %v2294_v11  ;;  %1582 = vmatprep.mubr.bf16.mxu1 %v2294_v11 }
0x1d7b   :  { %1512 = vmatpush1.bf16.msra.mxu0 %v2684_v34  ;;  %1553 = vmatpush1.bf16.msra.mxu1 %v2584_v1 }
0x1d7c   :  { %1513 = vmatprep.subr.bf16.mxu0 %v2690_v35  ;;  %1554 = vmatprep.subr.bf16.mxu1 %v2595_v4 }
0x1d7f   :  { %1514 = vmatpush1.bf16.msra.mxu0 %v2697_v10  ;;  %1555 = vmatpush1.bf16.msra.mxu1 %v2601_v46 }
0x1d80   :  { %1515 = vmatprep.subr.bf16.mxu0 %v2703_v37  ;;  %1556 = vmatprep.subr.bf16.mxu1 %v2609_v13 }
0x1d83   :  { %1516 = vmatpush1.bf16.msra.mxu0 %v2709_v39  ;;  %1557 = vmatpush1.bf16.msra.mxu1 %v2622_v50 }
0x1d84   :  { %1616 = vmatprep.subr.bf16.mxu0 %v2667_v32  ;;  %1657 = vmatprep.subr.bf16.mxu1 %v2566_v12 }
0x1e49   :  { %v1436_v48 = vpop.f32.mrb[36].mxu0  ;;  %v1477_v49 = vpop.f32.mrb[36].mxu1 }
0x1e4a   :  { %v1437_v52 = vadd.f32 %v1436_v48, %v2739_v51  ;;  %v1478_v54 = vadd.f32 %v1477_v49, %v2653_v6  ;;  %v1438_v55 = vpop.f32.mrb[37].mxu0  ;;  %v1479_v60 = vpop.f32.mrb[37].mxu1 }
0x1e4b   :  { %v1440_v56 = vpop.f32.mrb[38].mxu0  ;;  %v1481_v57 = vpop.f32.mrb[38].mxu1  ;;  %v1480_v3 = vadd.f32 %v1479_v60, %v2660_v26  ;;  %v2835_v7 = vadd.f32 %v1438_v55, %v2744_v63 }
0x1e4c   :  { %v1484_v15 = vadd.f32 %v1478_v54, %v1437_v52  ;;  %v1441_v58 = vpop.f32.mrb[39].mxu0  ;;  %v1482_v59 = vpop.f32.mrb[39].mxu1 }
0x1e4e   :  { %v2011_v61 = vmul.f32 -1.442695, %v1484_v15 }
0x1e50   :  { %2268 = vpow2.f32 %v2011_v61 }
0x1e5a   :  { %v2269_v62 = vpop.eup %2268 }
0x1e5b   :  { %v1488_v2 = vadd.f32 1.0, %v2269_v62 }
0x1e5d   :  { %2270 = vrcp.f32 %v1488_v2 }
0x1e67   :  { %v2271_v5 = vpop.eup %2270 }
0x1e68   :  { %v1491_v8 = vmul.f32 %v2271_v5, %v1480_v3  ;;  %v1494_v19 = vsub.f32 1.0, %v2271_v5  ;;  %v1500_v21 = vmul.f32 %v2271_v5, %v1394_v44 }
0x1e6a   :  { %v1492_v17 = vadd.f32 %v1491_v8, %v2835_v7 }
0x1e6c   :  { %2272 = vtanh.f32 %v1492_v17 }
0x1e76   :  { %v2273_v18 = vpop.eup %2272 }
0x1e77   :  { %1496 = vrot.lane.b32.xlu0 %v2273_v18, %s2295_s27 }
0x1ee9   :  { %v1497_v20 = vpop.permute.xlu0 %1496 }
0x1eea   :  { %v1499_v23 = vmul.f32 %v1497_v20, %v1494_v19 }
0x1eec   :  { %v1501_v24 = vadd.f32 %v1500_v21, %v1499_v23 }
0x1eee   :  { %v1502_v25 = vpack.c.bf16 %v1501_v24, %v1501_v24 }
0x1ef0   :  { %1504 = vrot.lane.b32.xlu1 %v1502_v25, %s2295_s27 }
0x1f62   :  { %v1505_v27 = vpop.permute.xlu1 %1504 }
0x1f63   :  { %2012 = vmatmul.mubr.msk.bf16.vlgmr.msra.gmra.mrb[40].mxu0 %vm956_vm4, %v1505_v27  ;;  %2013 = vmatmul.mubr.msk.bf16.vlgmr.msra.gmra.mrb[40].mxu1 %vm956_vm4, %v1505_v27 }
0x1f64   :  { %1617 = vmatpush1.bf16.msra.mxu0 %v2672_v33  ;;  %1658 = vmatpush1.bf16.msra.mxu1 %v2571_v36 }
0x1f65   :  { %1618 = vmatprep.subr.bf16.mxu0 %v2678_v14  ;;  %1659 = vmatprep.subr.bf16.mxu1 %v2579_v38 }
0x1f66   :  { %1648 = vmatprep.mubr.bf16.mxu0 %v2294_v11  ;;  %1689 = vmatprep.mubr.bf16.mxu1 %v2294_v11 }
0x1f68   :  { %1619 = vmatpush1.bf16.msra.mxu0 %v2684_v34  ;;  %1660 = vmatpush1.bf16.msra.mxu1 %v2584_v1 }
0x1f69   :  { %1620 = vmatprep.subr.bf16.mxu0 %v2690_v35  ;;  %1661 = vmatprep.subr.bf16.mxu1 %v2595_v4 }
0x1f6c   :  { %1621 = vmatpush1.bf16.msra.mxu0 %v2697_v10  ;;  %1662 = vmatpush1.bf16.msra.mxu1 %v2601_v46 }
0x1f6d   :  { %1622 = vmatprep.subr.bf16.mxu0 %v2703_v37  ;;  %1663 = vmatprep.subr.bf16.mxu1 %v2609_v13 }
0x1f70   :  { %1623 = vmatpush1.bf16.msra.mxu0 %v2709_v39  ;;  %1664 = vmatpush1.bf16.msra.mxu1 %v2622_v50 }
0x1f71   :  { %1723 = vmatprep.subr.bf16.mxu0 %v2667_v32  ;;  %1764 = vmatprep.subr.bf16.mxu1 %v2566_v12 }
0x2036   :  { %v1543_v28 = vpop.f32.mrb[40].mxu0  ;;  %v1584_v9 = vpop.f32.mrb[40].mxu1 }
0x2037   :  { %v1544_v30 = vadd.f32 %v1543_v28, %v2739_v51  ;;  %v1585_v31 = vadd.f32 %v1584_v9, %v2653_v6  ;;  %v1545_v22 = vpop.f32.mrb[41].mxu0  ;;  %v1586_v40 = vpop.f32.mrb[41].mxu1 }
0x2038   :  { %v1547_v41 = vpop.f32.mrb[42].mxu0  ;;  %v1588_v42 = vpop.f32.mrb[42].mxu1  ;;  %v1587_v12 = vadd.f32 %v1586_v40, %v2660_v26  ;;  %v2864_v52 = vadd.f32 %v1545_v22, %v2744_v63 }
0x2039   :  { %v1591_v43 = vadd.f32 %v1585_v31, %v1544_v30  ;;  %v1548_v44 = vpop.f32.mrb[43].mxu0  ;;  %v1589_v45 = vpop.f32.mrb[43].mxu1 }
0x203b   :  { %v2014_v47 = vmul.f32 -1.442695, %v1591_v43 }
0x203d   :  { %2274 = vpow2.f32 %v2014_v47 }
0x2047   :  { %v2275_v48 = vpop.eup %2274 }
0x2048   :  { %v1595_v49 = vadd.f32 1.0, %v2275_v48 }
0x204a   :  { %2276 = vrcp.f32 %v1595_v49 }
0x2054   :  { %v2277_v32 = vpop.eup %2276 }
0x2055   :  { %v1598_v54 = vmul.f32 %v2277_v32, %v1587_v12  ;;  %v1601_v56 = vsub.f32 1.0, %v2277_v32  ;;  %v1607_v15 = vmul.f32 %v2277_v32, %v1501_v24 }
0x2057   :  { %v1599_v55 = vadd.f32 %v1598_v54, %v2864_v52 }
0x2059   :  { %2278 = vtanh.f32 %v1599_v55  ;;  %v2192_v55 = vld [vmem:[%s2949_s12] sm:$0xff]  }
0x2063   :  { %v2279_v60 = vpop.eup %2278 }
0x2064   :  { %1603 = vrot.lane.b32.xlu0 %v2279_v60, %s2295_s27 }
0x20d6   :  { %v1604_v57 = vpop.permute.xlu0 %1603 }
0x20d7   :  { %v1606_v58 = vmul.f32 %v1604_v57, %v1601_v56 }
0x20d9   :  { %v1608_v59 = vadd.f32 %v1607_v15, %v1606_v58 }
0x20db   :  { %v1609_v61 = vpack.c.bf16 %v1608_v59, %v1608_v59 }
0x20dd   :  { %1611 = vrot.lane.b32.xlu1 %v1609_v61, %s2295_s27 }
0x214f   :  { %v1612_v62 = vpop.permute.xlu1 %1611 }
0x2150   :  { %2015 = vmatmul.mubr.msk.bf16.vlgmr.msra.gmra.mrb[44].mxu0 %vm956_vm4, %v1612_v62  ;;  %2016 = vmatmul.mubr.msk.bf16.vlgmr.msra.gmra.mrb[44].mxu1 %vm956_vm4, %v1612_v62 }
0x2151   :  { %1724 = vmatpush1.bf16.msra.mxu0 %v2672_v33  ;;  %1765 = vmatpush1.bf16.msra.mxu1 %v2571_v36 }
0x2152   :  { %1725 = vmatprep.subr.bf16.mxu0 %v2678_v14  ;;  %1766 = vmatprep.subr.bf16.mxu1 %v2579_v38 }
0x2153   :  { %1755 = vmatprep.mubr.bf16.mxu0 %v2294_v11  ;;  %1796 = vmatprep.mubr.bf16.mxu1 %v2294_v11 }
0x2155   :  { %1726 = vmatpush1.bf16.msra.mxu0 %v2684_v34  ;;  %1767 = vmatpush1.bf16.msra.mxu1 %v2584_v1 }
0x2156   :  { %1727 = vmatprep.subr.bf16.mxu0 %v2690_v35  ;;  %1768 = vmatprep.subr.bf16.mxu1 %v2595_v4 }
0x2159   :  { %1728 = vmatpush1.bf16.msra.mxu0 %v2697_v10  ;;  %1769 = vmatpush1.bf16.msra.mxu1 %v2601_v46 }
0x215a   :  { %1729 = vmatprep.subr.bf16.mxu0 %v2703_v37  ;;  %1770 = vmatprep.subr.bf16.mxu1 %v2609_v13 }
0x215d   :  { %1730 = vmatpush1.bf16.msra.mxu0 %v2709_v39  ;;  %1771 = vmatpush1.bf16.msra.mxu1 %v2622_v50 }
0x215e   :  { %2139 = vmatprep.subr.bf16.mxu0 %v2292_v0 }
0x2223   :  { %v1650_v11 = vpop.f32.mrb[44].mxu0  ;;  %v1691_v36 = vpop.f32.mrb[44].mxu1 }
0x2224   :  { %v1651_v38 = vadd.f32 %v1650_v11, %v2739_v51  ;;  %v1692_v1 = vadd.f32 %v1691_v36, %v2653_v6  ;;  %v1652_v4 = vpop.f32.mrb[45].mxu0  ;;  %v1693_v33 = vpop.f32.mrb[45].mxu1 }
0x2225   :  { %v1654_v14 = vpop.f32.mrb[46].mxu0  ;;  %v1695_v46 = vpop.f32.mrb[46].mxu1  ;;  %v1694_v50 = vadd.f32 %v1693_v33, %v2660_v26  ;;  %v2892_v3 = vadd.f32 %v1652_v4, %v2744_v63 }
0x2226   :  { %v1698_v34 = vadd.f32 %v1692_v1, %v1651_v38  ;;  %v1655_v35 = vpop.f32.mrb[47].mxu0  ;;  %v1696_v10 = vpop.f32.mrb[47].mxu1 }
0x2228   :  { %v2017_v13 = vmul.f32 -1.442695, %v1698_v34 }
0x222a   :  { %2280 = vpow2.f32 %v2017_v13 }
0x2234   :  { %v2281_v37 = vpop.eup %2280 }
0x2235   :  { %v1702_v39 = vadd.f32 1.0, %v2281_v37 }
0x2237   :  { %2282 = vrcp.f32 %v1702_v39 }
0x2241   :  { %v2283_v2 = vpop.eup %2282 }
0x2242   :  { %v1705_v5 = vmul.f32 %v2283_v2, %v1694_v50  ;;  %v1708_v18 = vsub.f32 1.0, %v2283_v2  ;;  %v1714_v20 = vmul.f32 %v2283_v2, %v1608_v59 }
0x2244   :  { %v1706_v8 = vadd.f32 %v1705_v5, %v2892_v3 }
0x2246   :  { %2284 = vtanh.f32 %v1706_v8 }
0x2250   :  { %v2285_v17 = vpop.eup %2284 }
0x2251   :  { %1710 = vrot.lane.b32.xlu0 %v2285_v17, %s2295_s27 }
0x22c3   :  { %v1711_v19 = vpop.permute.xlu0 %1710 }
0x22c4   :  { %v1713_v21 = vmul.f32 %v1711_v19, %v1708_v18 }
0x22c6   :  { %v1715_v23 = vadd.f32 %v1714_v20, %v1713_v21 }
0x22c8   :  { %v1716_v24 = vpack.c.bf16 %v1715_v23, %v1715_v23 }
0x22ca   :  { %1718 = vrot.lane.b32.xlu1 %v1716_v24, %s2295_s27 }
0x233c   :  { %v1719_v25 = vpop.permute.xlu1 %1718 }
0x233d   :  { %2018 = vmatmul.mubr.msk.bf16.vlgmr.msra.gmra.mrb[48].mxu0 %vm956_vm4, %v1719_v25  ;;  %2019 = vmatmul.mubr.msk.bf16.vlgmr.msra.gmra.mrb[48].mxu1 %vm956_vm4, %v1719_v25 }
0x233e   :  { %2147 = vmatprep.mubr.msk.bf16.mxu0 %vm2293_vm1, %v2292_v0  ;;  %2140 = vmatpush3.bf16.msra.mxu0 %v2192_v55 }
0x233f   :  { %2141 = vmatprep.subr.bf16.mxu0 %v2292_v0 }
0x2410   :  { %v1757_v27 = vpop.f32.mrb[48].mxu0  ;;  %v1798_v28 = vpop.f32.mrb[48].mxu1 }
0x2411   :  { %v1758_v9 = vadd.f32 %v1757_v27, %v2739_v51  ;;  %v1799_v30 = vadd.f32 %v1798_v28, %v2653_v6  ;;  %v1759_v31 = vpop.f32.mrb[49].mxu0  ;;  %v1800_v22 = vpop.f32.mrb[49].mxu1 }
0x2412   :  { %v1761_v40 = vpop.f32.mrb[50].mxu0  ;;  %v1802_v41 = vpop.f32.mrb[50].mxu1  ;;  %v1801_v49 = vadd.f32 %v1800_v22, %v2660_v26  ;;  %v1760_v32 = vadd.f32 %v1759_v31, %v2744_v63  ;;  %v2193_v26 = vld [vmem:[%s2949_s12 + $0x8] sm:$0xff]   ;;  %v2194_v63 = vld [vmem:[%s2949_s12 + $0x10] sm:$0xff]  }
0x2413   :  { %v1805_v42 = vadd.f32 %v1799_v30, %v1758_v9  ;;  %v1762_v43 = vpop.f32.mrb[51].mxu0  ;;  %v1803_v44 = vpop.f32.mrb[51].mxu1  ;;  %2142 = vmatpush3.bf16.msra.mxu0 %v2193_v26 }
0x2414   :  { %2143 = vmatprep.subr.bf16.mxu0 %v2292_v0 }
0x2415   :  { %v2020_v45 = vmul.f32 -1.442695, %v1805_v42 }
0x2417   :  { %2286 = vpow2.f32 %v2020_v45  ;;  %2144 = vmatpush3.bf16.msra.mxu0 %v2194_v63 }
0x2418   :  { %2145 = vmatprep.subr.bf16.mxu0 %v2292_v0  ;;  %v2021_v0 = vld [vmem:[%s2950_s13] ss:$0 sm:$0xff] }
0x2421   :  { %v2287_v47 = vpop.eup %2286 }
0x2422   :  { %v1809_v48 = vadd.f32 1.0, %v2287_v47 }
0x2424   :  { %2288 = vrcp.f32 %v1809_v48 }
0x242e   :  { %v2289_v12 = vpop.eup %2288 }
0x242f   :  { %v1812_v51 = vmul.f32 %v2289_v12, %v1801_v49 }
0x2431   :  { %v1813_v54 = vadd.f32 %v1812_v51, %v1760_v32 }
0x2433   :  { %2290 = vtanh.f32 %v1813_v54 }
0x243d   :  { %v2291_v6 = vpop.eup %2290 }
0x243e   :  { %1817 = vrot.lane.b32.xlu0 %v2291_v6, %s2295_s27 }
0x2442   :  { %1901 = vrot.lane.b32.xlu0 %v2748_v16, %s2295_s27  ;;  %v2195_v16 = vld [vmem:[%s2949_s12 + $0x18] sm:$0xff]  }
0x2443   :  { %2146 = vmatpush3.bf16.msra.mxu0 %v2195_v16 }
0x2446   :  { %1909 = vrot.lane.b32.xlu0 %v2806_v29, %s2299_s19  ;;  %v1815_v29 = vsub.f32 1.0, %v2289_v12 }
0x244a   :  { %1917 = vrot.lane.b32.xlu0 %v2864_v52, %s2300_s1  ;;  %v1821_v52 = vmul.f32 %v2289_v12, %v1715_v23 }
0x244e   :  { %1925 = vrot.lane.b32.xlu0 %v1760_v32, %s2301_s21 }
0x24b0   :  { %v1818_v60 = vpop.permute.xlu0 %1817 }
0x24b1   :  { %v1820_v56 = vmul.f32 %v1818_v60, %v1815_v29 }
0x24b3   :  { %v1822_v57 = vadd.f32 %v1821_v52, %v1820_v56 }
0x24b4   :  { %v1902_v36 = vpop.permute.xlu0 %1901 }
0x24b5   :  { %v1823_v15 = vpack.c.bf16 %v1822_v57, %v1822_v57 }
0x24b7   :  { %1831 = vrot.lane.b32.xlu1 %v1823_v15, %s2295_s27  ;;  %s2305_s27 = smov 14  }
0x24bb   :  { %1905 = vrot.lane.b32.xlu1 %v2777_v53, %s2302_s22 }
0x24bf   :  { %1913 = vrot.lane.b32.xlu1 %v2835_v7, %s2303_s2  ;;  %v1910_v7 = vpop.permute.xlu0 %1909 }
0x24c3   :  { %1921 = vrot.lane.b32.xlu1 %v2892_v3, %s2304_s23  ;;  %v1918_v14 = vpop.permute.xlu0 %1917 }
0x24c7   :  { %v1926_v13 = vpop.permute.xlu0 %1925 }
0x2529   :  { %v1832_v58 = vpop.permute.xlu1 %1831 }
0x252a   :  { %2148 = vmatmul.mubr.msk.bf16.vlgmr.msra.gmra.mrb[52].mxu0 %vm956_vm4, %v1832_v58 }
0x252d   :  { %v1906_v38 = vpop.permute.xlu1 %1905 }
0x252e   :  { %v1932_v4 = vsel %vm126_vm2, %v1902_v36, %v1906_v38 }
0x252f   :  { %v1934_v33 = vsel %vm1933_vm5, %v1932_v4, %v1910_v7 }
0x2531   :  { %v1914_v1 = vpop.permute.xlu1 %1913 }
0x2532   :  { %v1936_v46 = vsel %vm1935_vm6, %v1934_v33, %v1914_v1 }
0x2533   :  { %v1938_v35 = vsel %vm1937_vm7, %v1936_v46, %v1918_v14 }
0x2535   :  { %v1922_v34 = vpop.permute.xlu1 %1921 }
0x2536   :  { %v1940_v10 = vsel %vm1939_vm8, %v1938_v35, %v1922_v34 }
0x2537   :  { %v1942_v39 = vsel %vm1941_vm9, %v1940_v10, %v1926_v13 }
0x25fd   :  { %v1894_v59 = vpop.f32.mrb[52].mxu0 }
0x25fe   :  { %v1895_v61 = vadd.f32 %v2021_v0, %v1894_v59  ;;  %v2149_v62 = vpop.f32.mrb[53].mxu0 }
0x25ff   :  { %v1897_v11 = vpop.f32.mrb[54].mxu0 }
0x2600   :  { %1929 = vrot.lane.b32.xlu1 %v1895_v61, %s2305_s27  ;;  %v2150_v53 = vpop.f32.mrb[55].mxu0 }
0x2672   :  { %v1930_v37 = vpop.permute.xlu1 %1929 }
0x2673   :  { %v1944_v50 = vsel %vm1943_vm10, %v1942_v39, %v1930_v37 }
0x2674   :  { %1946 = vst.msk [vmem:[%s2951_s14] sm:$0xff] %vm1945_vm11, %v1944_v50 }

</bundles_post_ra>
